<compile_context>
chip_gen: v7x
topology: tpu7x:2x2x1
jax: 0.10.0
libtpu: 0.0.40
codegen_flags: <defaults>
</compile_context>

<pallas_src>
import math

import jax
import jax.numpy as jnp
from jax.experimental import pallas as pl
from jax.experimental.pallas import tpu as pltpu

# ----- true (PyTorch) dims -----
D_IN = 13 * 6 * 7                      # 546
DIMS = [D_IN, D_IN, 256, 32, 32, 1]    # fc1 .. fc5


def _ceil_to(n, m):
    return ((n + m - 1) // m) * m


# Per-layer padded (in, out) dims.  Only the large layers get 128-lane padding;
# 256/32/32 stay exact (full-array blocks allow non-128 trailing dims).  The
# final output is padded to 128 so the last store is unmasked/lane-dense.
PIN  = [_ceil_to(DIMS[0], 128), _ceil_to(DIMS[1], 128), DIMS[2], DIMS[3], DIMS[4]]
POUT = [PIN[1],                 DIMS[2],                DIMS[3], DIMS[4],
        _ceil_to(DIMS[5], 128)]
# PIN  = [640, 640, 256, 32, 32]
# POUT = [640, 256,  32, 32, 128]


def _pad_to(x, shape):
    pads = [(0, s - d) for d, s in zip(x.shape, shape)]
    return jnp.pad(x, pads)


# --------------------------------------------------------------------------
# Kernel: fused 5-layer MLP (bf16 MXU inputs, f32 accumulation / bias / ReLU)
# --------------------------------------------------------------------------
def _mlp_kernel(x_ref,
                w1_ref, b1_ref, w2_ref, b2_ref, w3_ref, b3_ref,
                w4_ref, b4_ref, w5_ref, b5_ref,
                o_ref):
    def dense(h, w_ref, b_ref, relu):
        # Cast activation to bf16 right before the dot; weights are already bf16.
        y = jnp.dot(h.astype(jnp.bfloat16), w_ref[...],
                    preferred_element_type=jnp.float32) + b_ref[...]
        return jnp.maximum(y, 0.0) if relu else y

    h = x_ref[...]                      # f32 (tb, 640)
    h = dense(h, w1_ref, b1_ref, True)
    h = dense(h, w2_ref, b2_ref, True)
    h = dense(h, w3_ref, b3_ref, True)
    h = dense(h, w4_ref, b4_ref, True)
    o_ref[...] = dense(h, w5_ref, b5_ref, False)


# --------------------------------------------------------------------------
# One-time parameter preparation (padding + bf16 cast) — NOT in the call path.
# --------------------------------------------------------------------------
def prepare_params(params):
    """Pad to TPU-aligned shapes and cast weights to bf16, once at init."""
    padded = []
    for li in range(5):
        w = params[f"w{li + 1}"]                          # (in, out) f32
        b = params[f"b{li + 1}"]                          # (out,)    f32
        w_p = _pad_to(w, (PIN[li], POUT[li])).astype(jnp.bfloat16)
        b_p = _pad_to(b.reshape(1, -1), (1, POUT[li])).astype(jnp.float32)
        padded += [w_p, b_p]
    return tuple(jax.device_put(p) for p in padded)


# --------------------------------------------------------------------------
# Forward wrapper
# --------------------------------------------------------------------------
@jax.jit
def simple_model_forward(x, padded_params):
    """x: (batch, 546) float32.  Returns (batch, 1) float32."""
    batch = x.shape[0]                     # static under jit
    b8 = max(8, _ceil_to(batch, 8))        # sublane-aligned batch
    tb = b8 if b8 <= 256 else 256          # batch tile (grid over batch if big)
    b_pad = _ceil_to(b8, tb)
    grid = (b_pad // tb,)

    x_p = _pad_to(x.astype(jnp.float32), (b_pad, PIN[0]))

    in_specs = [pl.BlockSpec((tb, PIN[0]), lambda i: (i, 0))]
    for li in range(5):
        # Weights/biases: full-array blocks, constant index -> resident across grid.
        in_specs.append(pl.BlockSpec((PIN[li], POUT[li]), lambda i: (0, 0)))
        in_specs.append(pl.BlockSpec((1, POUT[li]), lambda i: (0, 0)))
    out_spec = pl.BlockSpec((tb, POUT[-1]), lambda i: (i, 0))

    weight_bytes = sum(PIN[li] * POUT[li] * 2 for li in range(5))   # bf16
    bias_bytes = sum(POUT[li] * 4 for li in range(5))               # f32
    io_bytes = b_pad * PIN[0] * 4 + b_pad * POUT[-1] * 4
    flops = 2 * b_pad * sum(PIN[li] * POUT[li] for li in range(5))

    out_p = pl.pallas_call(
        _mlp_kernel,
        out_shape=jax.ShapeDtypeStruct((b_pad, POUT[-1]), jnp.float32),
        grid=grid,
        in_specs=in_specs,
        out_specs=out_spec,
        compiler_params=pltpu.CompilerParams(
            dimension_semantics=("parallel",)),
        cost_estimate=pl.CostEstimate(
            flops=flops,
            transcendentals=0,
            bytes_accessed=weight_bytes + bias_bytes + io_bytes),
    )(x_p, *padded_params)

    # un-pad: valid batch rows, first (true) output column
    return out_p[:batch, :DIMS[-1]]


# --------------------------------------------------------------------------
# Init + reference
# --------------------------------------------------------------------------
def init_params(key):
    """PyTorch nn.Linear default init (U[-1/sqrt(in), 1/sqrt(in)]), weights
    stored pre-transposed as (in, out)."""
    params = {}
    for li in range(5):
        d_in, d_out = DIMS[li], DIMS[li + 1]
        key, kw, kb = jax.random.split(key, 3)
        bound = 1.0 / math.sqrt(d_in)
        params[f"w{li + 1}"] = jax.random.uniform(
            kw, (d_in, d_out), jnp.float32, minval=-bound, maxval=bound)
        params[f"b{li + 1}"] = jax.random.uniform(
            kb, (d_out,), jnp.float32, minval=-bound, maxval=bound)
    return params


def _reference_forward(x, params):
    """Pure-JAX reference mirroring the kernel's quantization: bf16 dot inputs,
    f32 accumulation, f32 bias/ReLU."""
    h = x.astype(jnp.float32)
    for li in range(5):
        w = params[f"w{li + 1}"].astype(jnp.bfloat16)
        b = params[f"b{li + 1}"].astype(jnp.float32)
        h = jnp.dot(h.astype(jnp.bfloat16), w,
                    preferred_element_type=jnp.float32) + b
        if li < 4:
            h = jnp.maximum(h, 0.0)
    return h


# TODO(synk): the PyTorch module's training utilities (MSELoss, Adam, dataset
# I/O) are not part of the forward pass and are not implemented here.

if __name__ == "__main__":
    params = init_params(jax.random.PRNGKey(0))
    padded_params = prepare_params(params)      # one-time pad + bf16 cast

    base_key = jax.random.PRNGKey(0)
    _, k_x = jax.random.split(base_key)

    # batch=2: small path; batch=300: exercises dynamic batch pad + batch grid.
    for batch in (2, 300):
        x = jax.random.uniform(jax.random.fold_in(k_x, batch),
                               (batch, D_IN), jnp.float32)
        out = jax.block_until_ready(simple_model_forward(x, padded_params))
        assert out.shape == (batch, 1), out.shape

        ref = _reference_forward(x, params)
        max_err = float(jnp.max(jnp.abs(out - ref)))
        assert jnp.allclose(out, ref, atol=2e-3, rtol=2e-3), max_err

    print("KERNEL_OK")
</pallas_src>

<mosaic_0001>
module attributes {stable_mosaic.version = 11 : i64} {
  func.func @_mlp_kernel(%arg0: i32, %arg1: memref<8x640xf32, #tpu.memory_space<vmem>>, %arg2: memref<640x640xbf16, #tpu.memory_space<vmem>>, %arg3: memref<1x640xf32, #tpu.memory_space<vmem>>, %arg4: memref<640x256xbf16, #tpu.memory_space<vmem>>, %arg5: memref<1x256xf32, #tpu.memory_space<vmem>>, %arg6: memref<256x32xbf16, #tpu.memory_space<vmem>>, %arg7: memref<1x32xf32, #tpu.memory_space<vmem>>, %arg8: memref<32x32xbf16, #tpu.memory_space<vmem>>, %arg9: memref<1x32xf32, #tpu.memory_space<vmem>>, %arg10: memref<32x128xbf16, #tpu.memory_space<vmem>>, %arg11: memref<1x128xf32, #tpu.memory_space<vmem>>, %arg12: memref<8x128xf32, #tpu.memory_space<vmem>>) attributes {dimension_semantics = [#tpu.dimension_semantics<parallel>], iteration_bounds = array<i64: 1>, scalar_prefetch = 0 : i64, scratch_operands = 0 : i64, tpu.core_type = #tpu.core_type<tc>, window_params = [{transform_indices = @transform_0, window_bounds = array<i64: 8, 640>}, {pipeline_mode = #tpu.pipeline_mode<synchronous>, transform_indices = @transform_1, window_bounds = array<i64: 640, 640>}, {pipeline_mode = #tpu.pipeline_mode<synchronous>, transform_indices = @transform_2, window_bounds = array<i64: 1, 640>}, {pipeline_mode = #tpu.pipeline_mode<synchronous>, transform_indices = @transform_3, window_bounds = array<i64: 640, 256>}, {pipeline_mode = #tpu.pipeline_mode<synchronous>, transform_indices = @transform_4, window_bounds = array<i64: 1, 256>}, {pipeline_mode = #tpu.pipeline_mode<synchronous>, transform_indices = @transform_5, window_bounds = array<i64: 256, 32>}, {pipeline_mode = #tpu.pipeline_mode<synchronous>, transform_indices = @transform_6, window_bounds = array<i64: 1, 32>}, {pipeline_mode = #tpu.pipeline_mode<synchronous>, transform_indices = @transform_7, window_bounds = array<i64: 32, 32>}, {pipeline_mode = #tpu.pipeline_mode<synchronous>, transform_indices = @transform_8, window_bounds = array<i64: 1, 32>}, {pipeline_mode = #tpu.pipeline_mode<synchronous>, transform_indices = @transform_9, window_bounds = array<i64: 32, 128>}, {pipeline_mode = #tpu.pipeline_mode<synchronous>, transform_indices = @transform_10, window_bounds = array<i64: 1, 128>}, {transform_indices = @transform_11, window_bounds = array<i64: 8, 128>}]} {
    %c0 = arith.constant 0 : index
    %c0_0 = arith.constant 0 : index
    %0 = vector.load %arg1[%c0, %c0_0] : memref<8x640xf32, #tpu.memory_space<vmem>>, vector<8x640xf32>
    %1 = arith.truncf %0 : vector<8x640xf32> to vector<8x640xbf16>
    %c0_1 = arith.constant 0 : index
    %c0_2 = arith.constant 0 : index
    %2 = vector.load %arg2[%c0_1, %c0_2] : memref<640x640xbf16, #tpu.memory_space<vmem>>, vector<640x640xbf16>
    %cst = arith.constant dense<0.000000e+00> : vector<8x640xf32>
    %3 = tpu.matmul %1, %2, %cst {dimension_numbers = #tpu.dot_dimension_numbers<[1], [0], [0], [1], [0, 0, 1, 1], [], []>} : vector<8x640xbf16>, vector<640x640xbf16>, vector<8x640xf32> -> vector<8x640xf32>
    %c0_3 = arith.constant 0 : index
    %c0_4 = arith.constant 0 : index
    %4 = vector.load %arg3[%c0_3, %c0_4] : memref<1x640xf32, #tpu.memory_space<vmem>>, vector<1x640xf32>
    %5 = vector.broadcast %4 : vector<1x640xf32> to vector<8x640xf32>
    %6 = arith.addf %3, %5 : vector<8x640xf32>
    %cst_5 = arith.constant 0.000000e+00 : f32
    %7 = vector.broadcast %cst_5 : f32 to vector<8x640xf32>
    %8 = arith.maximumf %6, %7 : vector<8x640xf32>
    %9 = arith.truncf %8 : vector<8x640xf32> to vector<8x640xbf16>
    %c0_6 = arith.constant 0 : index
    %c0_7 = arith.constant 0 : index
    %10 = vector.load %arg4[%c0_6, %c0_7] : memref<640x256xbf16, #tpu.memory_space<vmem>>, vector<640x256xbf16>
    %cst_8 = arith.constant dense<0.000000e+00> : vector<8x256xf32>
    %11 = tpu.matmul %9, %10, %cst_8 {dimension_numbers = #tpu.dot_dimension_numbers<[1], [0], [0], [1], [0, 0, 1, 1], [], []>} : vector<8x640xbf16>, vector<640x256xbf16>, vector<8x256xf32> -> vector<8x256xf32>
    %c0_9 = arith.constant 0 : index
    %c0_10 = arith.constant 0 : index
    %12 = vector.load %arg5[%c0_9, %c0_10] : memref<1x256xf32, #tpu.memory_space<vmem>>, vector<1x256xf32>
    %13 = vector.broadcast %12 : vector<1x256xf32> to vector<8x256xf32>
    %14 = arith.addf %11, %13 : vector<8x256xf32>
    %cst_11 = arith.constant 0.000000e+00 : f32
    %15 = vector.broadcast %cst_11 : f32 to vector<8x256xf32>
    %16 = arith.maximumf %14, %15 : vector<8x256xf32>
    %17 = arith.truncf %16 : vector<8x256xf32> to vector<8x256xbf16>
    %c0_12 = arith.constant 0 : index
    %c0_13 = arith.constant 0 : index
    %18 = vector.load %arg6[%c0_12, %c0_13] : memref<256x32xbf16, #tpu.memory_space<vmem>>, vector<256x32xbf16>
    %cst_14 = arith.constant dense<0.000000e+00> : vector<8x32xf32>
    %19 = tpu.matmul %17, %18, %cst_14 {dimension_numbers = #tpu.dot_dimension_numbers<[1], [0], [0], [1], [0, 0, 1, 1], [], []>} : vector<8x256xbf16>, vector<256x32xbf16>, vector<8x32xf32> -> vector<8x32xf32>
    %c0_15 = arith.constant 0 : index
    %c0_16 = arith.constant 0 : index
    %20 = vector.load %arg7[%c0_15, %c0_16] : memref<1x32xf32, #tpu.memory_space<vmem>>, vector<1x32xf32>
    %21 = vector.broadcast %20 : vector<1x32xf32> to vector<8x32xf32>
    %22 = arith.addf %19, %21 : vector<8x32xf32>
    %cst_17 = arith.constant 0.000000e+00 : f32
    %23 = vector.broadcast %cst_17 : f32 to vector<8x32xf32>
    %24 = arith.maximumf %22, %23 : vector<8x32xf32>
    %25 = arith.truncf %24 : vector<8x32xf32> to vector<8x32xbf16>
    %c0_18 = arith.constant 0 : index
    %c0_19 = arith.constant 0 : index
    %26 = vector.load %arg8[%c0_18, %c0_19] : memref<32x32xbf16, #tpu.memory_space<vmem>>, vector<32x32xbf16>
    %cst_20 = arith.constant dense<0.000000e+00> : vector<8x32xf32>
    %27 = tpu.matmul %25, %26, %cst_20 {dimension_numbers = #tpu.dot_dimension_numbers<[1], [0], [0], [1], [0, 0, 1, 1], [], []>} : vector<8x32xbf16>, vector<32x32xbf16>, vector<8x32xf32> -> vector<8x32xf32>
    %c0_21 = arith.constant 0 : index
    %c0_22 = arith.constant 0 : index
    %28 = vector.load %arg9[%c0_21, %c0_22] : memref<1x32xf32, #tpu.memory_space<vmem>>, vector<1x32xf32>
    %29 = vector.broadcast %28 : vector<1x32xf32> to vector<8x32xf32>
    %30 = arith.addf %27, %29 : vector<8x32xf32>
    %cst_23 = arith.constant 0.000000e+00 : f32
    %31 = vector.broadcast %cst_23 : f32 to vector<8x32xf32>
    %32 = arith.maximumf %30, %31 : vector<8x32xf32>
    %33 = arith.truncf %32 : vector<8x32xf32> to vector<8x32xbf16>
    %c0_24 = arith.constant 0 : index
    %c0_25 = arith.constant 0 : index
    %34 = vector.load %arg10[%c0_24, %c0_25] : memref<32x128xbf16, #tpu.memory_space<vmem>>, vector<32x128xbf16>
    %cst_26 = arith.constant dense<0.000000e+00> : vector<8x128xf32>
    %35 = tpu.matmul %33, %34, %cst_26 {dimension_numbers = #tpu.dot_dimension_numbers<[1], [0], [0], [1], [0, 0, 1, 1], [], []>} : vector<8x32xbf16>, vector<32x128xbf16>, vector<8x128xf32> -> vector<8x128xf32>
    %c0_27 = arith.constant 0 : index
    %c0_28 = arith.constant 0 : index
    %36 = vector.load %arg11[%c0_27, %c0_28] : memref<1x128xf32, #tpu.memory_space<vmem>>, vector<1x128xf32>
    %37 = vector.broadcast %36 : vector<1x128xf32> to vector<8x128xf32>
    %38 = arith.addf %35, %37 : vector<8x128xf32>
    %c0_29 = arith.constant 0 : index
    %c0_30 = arith.constant 0 : index
    %39 = vector.load %arg12[%c0_29, %c0_30] : memref<8x128xf32, #tpu.memory_space<vmem>>, vector<8x128xf32>
    tpu.vector_store %arg12[%c0_29, %c0_30], %38 {strides = array<i32>} : memref<8x128xf32, #tpu.memory_space<vmem>>, vector<8x128xf32>,
    return
  }
  func.func @transform_0(%arg0: i32) -> (i32, i32) {
    %c0_i32 = arith.constant 0 : i32
    %c0_i32_0 = arith.constant 0 : i32
    return %arg0, %c0_i32 : i32, i32
  }
  func.func @transform_1(%arg0: i32) -> (i32, i32) {
    %c0_i32 = arith.constant 0 : i32
    %c0_i32_0 = arith.constant 0 : i32
    %c0_i32_1 = arith.constant 0 : i32
    return %c0_i32, %c0_i32_0 : i32, i32
  }
  func.func @transform_2(%arg0: i32) -> (i32, i32) {
    %c0_i32 = arith.constant 0 : i32
    %c0_i32_0 = arith.constant 0 : i32
    %c0_i32_1 = arith.constant 0 : i32
    return %c0_i32, %c0_i32_0 : i32, i32
  }
  func.func @transform_3(%arg0: i32) -> (i32, i32) {
    %c0_i32 = arith.constant 0 : i32
    %c0_i32_0 = arith.constant 0 : i32
    %c0_i32_1 = arith.constant 0 : i32
    return %c0_i32, %c0_i32_0 : i32, i32
  }
  func.func @transform_4(%arg0: i32) -> (i32, i32) {
    %c0_i32 = arith.constant 0 : i32
    %c0_i32_0 = arith.constant 0 : i32
    %c0_i32_1 = arith.constant 0 : i32
    return %c0_i32, %c0_i32_0 : i32, i32
  }
  func.func @transform_5(%arg0: i32) -> (i32, i32) {
    %c0_i32 = arith.constant 0 : i32
    %c0_i32_0 = arith.constant 0 : i32
    %c0_i32_1 = arith.constant 0 : i32
    return %c0_i32, %c0_i32_0 : i32, i32
  }
  func.func @transform_6(%arg0: i32) -> (i32, i32) {
    %c0_i32 = arith.constant 0 : i32
    %c0_i32_0 = arith.constant 0 : i32
    %c0_i32_1 = arith.constant 0 : i32
    return %c0_i32, %c0_i32_0 : i32, i32
  }
  func.func @transform_7(%arg0: i32) -> (i32, i32) {
    %c0_i32 = arith.constant 0 : i32
    %c0_i32_0 = arith.constant 0 : i32
    %c0_i32_1 = arith.constant 0 : i32
    return %c0_i32, %c0_i32_0 : i32, i32
  }
  func.func @transform_8(%arg0: i32) -> (i32, i32) {
    %c0_i32 = arith.constant 0 : i32
    %c0_i32_0 = arith.constant 0 : i32
    %c0_i32_1 = arith.constant 0 : i32
    return %c0_i32, %c0_i32_0 : i32, i32
  }
  func.func @transform_9(%arg0: i32) -> (i32, i32) {
    %c0_i32 = arith.constant 0 : i32
    %c0_i32_0 = arith.constant 0 : i32
    %c0_i32_1 = arith.constant 0 : i32
    return %c0_i32, %c0_i32_0 : i32, i32
  }
  func.func @transform_10(%arg0: i32) -> (i32, i32) {
    %c0_i32 = arith.constant 0 : i32
    %c0_i32_0 = arith.constant 0 : i32
    %c0_i32_1 = arith.constant 0 : i32
    return %c0_i32, %c0_i32_0 : i32, i32
  }
  func.func @transform_11(%arg0: i32) -> (i32, i32) {
    %c0_i32 = arith.constant 0 : i32
    %c0_i32_0 = arith.constant 0 : i32
    return %arg0, %c0_i32 : i32, i32
  }
}

</mosaic_0001>

<bundles_post_ra>
// kernel: simple_model_forward.1
= control target key start
LH: loop header
LB: loop body
LE: loop exit
PB: predicated region body
PF: predicated region fallthrough
CT: control target
= control target key end

     0   :  { %16 = vsyncpa [#allocation3], 0  ;;  %s3890_s0 = inlined_call_operand.vmem [shape: f32[8,640], index: 0, kind: input, shape index: {}]   ;;  %s3891_s1 = inlined_call_operand.hbm [shape: bf16[640,640], index: 1, kind: input, shape index: {}]   ;;  %s3892_s2 = inlined_call_operand.vmem [shape: f32[1,640], index: 2, kind: input, shape index: {}]   ;;  %s3893_s3 = inlined_call_operand.hbm [shape: bf16[640,256], index: 3, kind: input, shape index: {}]   ;;  %s3894_s4 = inlined_call_operand.vmem [shape: f32[1,256], index: 4, kind: input, shape index: {}]   ;;  %s3895_s5 = inlined_call_operand.vmem [shape: bf16[256,32], index: 5, kind: input, shape index: {}]   ;;  %s3896_s6 = inlined_call_operand.vmem [shape: f32[1,32], index: 6, kind: input, shape index: {}]   ;;  %s3897_s7 = inlined_call_operand.vmem [shape: bf16[32,32], index: 7, kind: input, shape index: {}]   ;;  %s3898_s8 = inlined_call_operand.vmem [shape: f32[1,32], index: 8, kind: input, shape index: {}]   ;;  %s3899_s9 = inlined_call_operand.vmem [shape: bf16[32,128], index: 9, kind: input, shape index: {}]   ;;  %s3900_s10 = inlined_call_operand.vmem [shape: f32[1,128], index: 10, kind: input, shape index: {}]   ;;  %s3901_s11 = inlined_call_operand.vmem [shape: f32[8,128], index: 11, kind: output, shape index: {}]  }
   0x1   :  { %17 = vsyncpa [#allocation5], 0  ;;  %s3625_s17 = smov [#allocation2]   ;;  %s3577_s21 = scalar_lea.hbm %s3891_s1, 25600 }
   0x2   :  { %s25_s18 = sshll.u32 %s3625_s17, 4  ;;  %p3578_p0 = scmp.ne.s32.totalorder %s3891_s1, %s3577_s21  ;;  %s26_s18 = int_to_ptr.vmem [resolvable:$true] %s25_s18 }
   0x3   :  { %p3581_p1 = scmp.lt.u32.totalorder %s3577_s21, %s3891_s1 }
   0x5   :  { %p3583_p2 = pnand %p3581_p1, %p3578_p0 }
   0x7   :  { %3586 = shalt.err (!%p3583_p2)
}
   0x8   :  { %s3587_s26 = scalar_lea.vmem %s26_s18, 25600  ;;  %p3592_p4 = scmp.lt.s32.totalorder %s26_s18, %s26_s18 }
   0x9   :  { %p3588_p3 = scmp.ne.s32.totalorder %s26_s18, %s3587_s26  ;;  %p3593_p5 = scmp.lt.s32.totalorder %s3587_s26, %s3587_s26 }
   0xb   :  { %p3594_p6 = por %p3593_p5, %p3592_p4 }
   0xd   :  { %p3595_p7 = pnand %p3594_p6, %p3588_p3 }
   0xf   :  { %3598 = shalt.err (!%p3595_p7)
}
  0x10   :  { %s3626_s27 = smov 320   ;;  %s3627_s28 = smov 20  }
  0x11   :  { %31 = dma.hbm_to_vmem [thread:$0]  %s3891_s1, 25600, %s26_s18, [#allocation3], %s3626_s27, %s3626_s27, %s3627_s28  }
  0x12   :  { %s3628_s12 = smov [#allocation4]   ;;  %s3599_s16 = scalar_lea.hbm %s3893_s3, 10240 }
  0x13   :  { %s39_s13 = sshll.u32 %s3628_s12, 4  ;;  %p3600_p8 = scmp.ne.s32.totalorder %s3893_s3, %s3599_s16  ;;  %s40_s13 = int_to_ptr.vmem [resolvable:$true] %s39_s13 }
  0x14   :  { %p3603_p9 = scmp.lt.u32.totalorder %s3599_s16, %s3893_s3 }
  0x16   :  { %p3605_p10 = pnand %p3603_p9, %p3600_p8 }
  0x18   :  { %3608 = shalt.err (!%p3605_p10)
}
  0x19   :  { %s3609_s22 = scalar_lea.vmem %s40_s13, 10240  ;;  %p3614_p12 = scmp.lt.s32.totalorder %s40_s13, %s40_s13 }
  0x1a   :  { %p3610_p11 = scmp.ne.s32.totalorder %s40_s13, %s3609_s22  ;;  %p3615_p13 = scmp.lt.s32.totalorder %s3609_s22, %s3609_s22 }
  0x1c   :  { %p3616_p0 = por %p3615_p13, %p3614_p12 }
  0x1e   :  { %p3617_p1 = pnand %p3616_p0, %p3610_p11 }
  0x20   :  { %3620 = shalt.err (!%p3617_p1)
}
  0x21   :  { %s3629_s1 = smov 128   ;;  %s3630_s18 = smov 8  }
  0x22   :  { %45 = dma.hbm_to_vmem [thread:$0]  %s3893_s3, 10240, %s40_s13, [#allocation5], %s3629_s1, %s3629_s1, %s3630_s18  }
  0x23   :  { %3621 = dma.done.wait [#allocation3], 25600  }
  0x24   :  { %3622 = vsyncadd [#allocation3], 4294941696 }
  0x25   :  { %3623 = dma.done.wait [#allocation5], 10240  }
  0x26   :  { %3624 = vsyncadd [#allocation5], 4294957056  ;;  %v3157_v0 = vld [vmem:[#allocation2 + $0x4] ss:$20 sps:$4 sm:$0xff]   ;;  %v3159_v1 = vld [vmem:[#allocation2] ss:$20 sps:$4 sm:$0xff]  }
  0x27   :  { %1384 = vmatprep.subr.bf16.mxu0 %v3157_v0  ;;  %v3160_v2 = vld [vmem:[#allocation2 + $0x2c] ss:$20 sps:$4 sm:$0xff]   ;;  %v3162_v3 = vld [vmem:[#allocation2 + $0x28] ss:$20 sps:$4 sm:$0xff]   ;;  %v3165_v5 = vld [vmem:[#allocation2 + $0x50] ss:$20 sps:$4 sm:$0xff]  }
  0x28   :  { %1385 = vmatpush1.bf16.msra.mxu0 %v3159_v1  ;;  %v3163_v4 = vld [vmem:[#allocation2 + $0x54] ss:$20 sps:$4 sm:$0xff]   ;;  %v3166_v6 = vld [vmem:[#allocation2 + $0x7c] ss:$20 sps:$4 sm:$0xff]   ;;  %v3178_v7 = vld [vmem:[#allocation2 + $0xc] ss:$20 sps:$4 sm:$0xff]  }
  0x29   :  { %1386 = vmatprep.subr.bf16.mxu0 %v3160_v2  ;;  %v3180_v8 = vld [vmem:[#allocation2 + $0x8] ss:$20 sps:$4 sm:$0xff]   ;;  %v3168_v9 = vld [vmem:[#allocation2 + $0x78] ss:$20 sps:$4 sm:$0xff]   ;;  %1507 = vmatprep.subr.bf16.mxu1 %v3178_v7  ;;  %v3186_v12 = vld [vmem:[#allocation2 + $0x30] ss:$20 sps:$4 sm:$0xff]  }
  0x2a   :  { %v3169_v10 = vld [vmem:[#allocation2 + $0xa4] ss:$20 sps:$4 sm:$0xff]   ;;  %v3184_v11 = vld [vmem:[#allocation2 + $0x34] ss:$20 sps:$4 sm:$0xff]   ;;  %1508 = vmatpush1.bf16.msra.mxu1 %v3180_v8  ;;  %v3190_v14 = vld [vmem:[#allocation2 + $0x5c] ss:$20 sps:$4 sm:$0xff]  }
  0x2b   :  { %1509 = vmatprep.subr.bf16.mxu1 %v3184_v11  ;;  %v3171_v13 = vld [vmem:[#allocation2 + $0xa0] ss:$20 sps:$4 sm:$0xff]   ;;  %v3192_v16 = vld [vmem:[#allocation2 + $0x58] ss:$20 sps:$4 sm:$0xff]   ;;  %v3174_v18 = vld [vmem:[#allocation2 + $0xc8] ss:$20 sps:$4 sm:$0xff]  }
  0x2c   :  { %1387 = vmatpush1.bf16.msra.mxu0 %v3162_v3  ;;  %v3172_v15 = vld [vmem:[#allocation2 + $0xcc] ss:$20 sps:$4 sm:$0xff]   ;;  %v3196_v17 = vld [vmem:[#allocation2 + $0x84] ss:$20 sps:$4 sm:$0xff]   ;;  %v3175_v19 = vld [vmem:[#allocation2 + $0xf4] ss:$20 sps:$4 sm:$0xff]  }
  0x2d   :  { %1388 = vmatprep.subr.bf16.mxu0 %v3163_v4  ;;  %v3198_v20 = vld [vmem:[#allocation2 + $0x80] ss:$20 sps:$4 sm:$0xff]   ;;  %v3177_v22 = vld [vmem:[#allocation2 + $0xf0] ss:$20 sps:$4 sm:$0xff]   ;;  %v3204_v24 = vld [vmem:[#allocation2 + $0xa8] ss:$20 sps:$4 sm:$0xff]  }
  0x2e   :  { %1510 = vmatpush1.bf16.msra.mxu1 %v3186_v12  ;;  %v3202_v21 = vld [vmem:[#allocation2 + $0xac] ss:$20 sps:$4 sm:$0xff]   ;;  %v3181_v23 = vld [vmem:[#allocation2 + $0x11c] ss:$20 sps:$4 sm:$0xff]   ;;  %v3208_v25 = vld [vmem:[#allocation2 + $0xd4] ss:$20 sps:$4 sm:$0xff]  }
  0x2f   :  { %1511 = vmatprep.subr.bf16.mxu1 %v3190_v14  ;;  %v3183_v26 = vld [vmem:[#allocation2 + $0x118] ss:$20 sps:$4 sm:$0xff]   ;;  %v3210_v28 = vld [vmem:[#allocation2 + $0xd0] ss:$20 sps:$4 sm:$0xff]   ;;  %v3189_v30 = vld [vmem:[#allocation2 + $0x140] ss:$20 sps:$4 sm:$0xff]  }
  0x30   :  { %1389 = vmatpush1.bf16.msra.mxu0 %v3165_v5  ;;  %v3187_v27 = vld [vmem:[#allocation2 + $0x144] ss:$20 sps:$4 sm:$0xff]   ;;  %v3214_v29 = vld [vmem:[#allocation2 + $0xfc] ss:$20 sps:$4 sm:$0xff]   ;;  %v3193_v31 = vld [vmem:[#allocation2 + $0x16c] ss:$20 sps:$4 sm:$0xff]  }
  0x31   :  { %1390 = vmatprep.subr.bf16.mxu0 %v3166_v6  ;;  %v3216_v32 = vld [vmem:[#allocation2 + $0xf8] ss:$20 sps:$4 sm:$0xff]   ;;  %v3195_v35 = vld [vmem:[#allocation2 + $0x168] ss:$20 sps:$4 sm:$0xff]   ;;  %v3222_v38 = vld [vmem:[#allocation2 + $0x120] ss:$20 sps:$4 sm:$0xff]  }
  0x32   :  { %1512 = vmatpush1.bf16.msra.mxu1 %v3192_v16  ;;  %v3220_v33 = vld [vmem:[#allocation2 + $0x124] ss:$20 sps:$4 sm:$0xff]   ;;  %v68_v34 = vld [vmem:[%s3890_s0 + $0x8] sm:$0xff]  ;;  %v3205_v41 = vld [vmem:[#allocation2 + $0x1bc] ss:$20 sps:$4 sm:$0xff]   ;;  %vm3633_vm0 = vmmov 0  }
  0x33   :  { %1513 = vmatprep.subr.bf16.mxu1 %v3196_v17  ;;  %v3721_v36 = vpack.c.bf16 %v68_v34, %v68_v34  ;;  %v3199_v37 = vld [vmem:[#allocation2 + $0x194] ss:$20 sps:$4 sm:$0xff]   ;;  %v3226_v39 = vld [vmem:[#allocation2 + $0x14c] ss:$20 sps:$4 sm:$0xff]   ;;  %v3201_v40 = vld [vmem:[#allocation2 + $0x190] ss:$20 sps:$4 sm:$0xff]  }
  0x34   :  { %1391 = vmatpush1.bf16.msra.mxu0 %v3168_v9  ;;  %v3228_v42 = vld [vmem:[#allocation2 + $0x148] ss:$20 sps:$4 sm:$0xff]   ;;  %v3207_v44 = vld [vmem:[#allocation2 + $0x1b8] ss:$20 sps:$4 sm:$0xff]   ;;  %v3234_v46 = vld [vmem:[#allocation2 + $0x170] ss:$20 sps:$4 sm:$0xff]  }
  0x35   :  { %1392 = vmatprep.subr.bf16.mxu0 %v3169_v10  ;;  %1416 = vmatprep.mubr.bf16.mxu0 %v3721_v36  ;;  %v3232_v43 = vld [vmem:[#allocation2 + $0x174] ss:$20 sps:$4 sm:$0xff]   ;;  %v3211_v45 = vld [vmem:[#allocation2 + $0x1e4] ss:$20 sps:$4 sm:$0xff]   ;;  %v3238_v47 = vld [vmem:[#allocation2 + $0x19c] ss:$20 sps:$4 sm:$0xff]  }
  0x36   :  { %1514 = vmatpush1.bf16.msra.mxu1 %v3198_v20  ;;  %1539 = vmatprep.mubr.bf16.mxu1 %v3721_v36  ;;  %v3213_v48 = vld [vmem:[#allocation2 + $0x1e0] ss:$20 sps:$4 sm:$0xff]   ;;  %v3240_v50 = vld [vmem:[#allocation2 + $0x198] ss:$20 sps:$4 sm:$0xff]   ;;  %v3219_v52 = vld [vmem:[#allocation2 + $0x208] ss:$20 sps:$4 sm:$0xff]  }
  0x37   :  { %1515 = vmatprep.subr.bf16.mxu1 %v3202_v21  ;;  %v3217_v49 = vld [vmem:[#allocation2 + $0x20c] ss:$20 sps:$4 sm:$0xff]   ;;  %v3244_v51 = vld [vmem:[#allocation2 + $0x1c4] ss:$20 sps:$4 sm:$0xff]   ;;  %v3223_v53 = vld [vmem:[#allocation2 + $0x234] ss:$20 sps:$4 sm:$0xff]  }
  0x38   :  { %1393 = vmatpush1.bf16.msra.mxu0 %v3171_v13  ;;  %v3246_v54 = vld [vmem:[#allocation2 + $0x1c0] ss:$20 sps:$4 sm:$0xff]   ;;  %v3225_v56 = vld [vmem:[#allocation2 + $0x230] ss:$20 sps:$4 sm:$0xff]   ;;  %v3231_v58 = vld [vmem:[#allocation2 + $0x258] ss:$20 sps:$4 sm:$0xff]  }
  0x39   :  { %1394 = vmatprep.subr.bf16.mxu0 %v3172_v15  ;;  %v3250_v55 = vld [vmem:[#allocation2 + $0x1ec] ss:$20 sps:$4 sm:$0xff]   ;;  %v3229_v57 = vld [vmem:[#allocation2 + $0x25c] ss:$20 sps:$4 sm:$0xff]   ;;  %v3256_v60 = vld [vmem:[#allocation2 + $0x214] ss:$20 sps:$4 sm:$0xff]  }
  0x3a   :  { %1516 = vmatpush1.bf16.msra.mxu1 %v3204_v24  ;;  %v3252_v59 = vld [vmem:[#allocation2 + $0x1e8] ss:$20 sps:$4 sm:$0xff]   ;;  %v67_v61 = vld [vmem:[%s3890_s0] sm:$0xff]  ;;  %v3264_v4 = vld [vmem:[#allocation2 + $0x238] ss:$20 sps:$4 sm:$0xff]   ;;  %vm2579_vm1 = vcmask 261120  }
  0x3b   :  { %1517 = vmatprep.subr.bf16.mxu1 %v3208_v25  ;;  %v3237_v62 = vld [vmem:[#allocation2 + $0x284] ss:$20 sps:$4 sm:$0xff]   ;;  %v3728_v0 = vpack.c.bf16 %v67_v61, %v67_v61  ;;  %v3262_v1 = vld [vmem:[#allocation2 + $0x23c] ss:$20 sps:$4 sm:$0xff]   ;;  %v3235_v2 = vld [vmem:[#allocation2 + $0x280] ss:$20 sps:$4 sm:$0xff]  }
  0x3c   :  { %1395 = vmatpush1.bf16.msra.mxu0 %v3174_v18  ;;  %v3258_v63 = vld [vmem:[#allocation2 + $0x210] ss:$20 sps:$4 sm:$0xff]   ;;  %v3243_v3 = vld [vmem:[#allocation2 + $0x2ac] ss:$20 sps:$4 sm:$0xff]   ;;  %v3241_v6 = vld [vmem:[#allocation2 + $0x2a8] ss:$20 sps:$4 sm:$0xff]  }
  0x3d   :  { %1396 = vmatprep.subr.bf16.mxu0 %v3175_v19  ;;  %v3268_v5 = vld [vmem:[#allocation2 + $0x264] ss:$20 sps:$4 sm:$0xff]   ;;  %v3249_v7 = vld [vmem:[#allocation2 + $0x2d4] ss:$20 sps:$4 sm:$0xff]   ;;  %v3276_v9 = vld [vmem:[#allocation2 + $0x28c] ss:$20 sps:$4 sm:$0xff]  }
  0x3e   :  { %1518 = vmatpush1.bf16.msra.mxu1 %v3210_v28  ;;  %v3270_v8 = vld [vmem:[#allocation2 + $0x260] ss:$20 sps:$4 sm:$0xff]   ;;  %v3247_v10 = vld [vmem:[#allocation2 + $0x2d0] ss:$20 sps:$4 sm:$0xff]   ;;  %v3274_v12 = vld [vmem:[#allocation2 + $0x288] ss:$20 sps:$4 sm:$0xff]  }
  0x3f   :  { %1519 = vmatprep.subr.bf16.mxu1 %v3214_v29  ;;  %v3255_v11 = vld [vmem:[#allocation2 + $0x2fc] ss:$20 sps:$4 sm:$0xff]   ;;  %v3282_v13 = vld [vmem:[#allocation2 + $0x2b4] ss:$20 sps:$4 sm:$0xff]   ;;  %v3253_v14 = vld [vmem:[#allocation2 + $0x2f8] ss:$20 sps:$4 sm:$0xff]  }
  0x40   :  { %1397 = vmatpush1.bf16.msra.mxu0 %v3177_v22  ;;  %v3261_v15 = vld [vmem:[#allocation2 + $0x324] ss:$20 sps:$4 sm:$0xff]   ;;  %v3288_v17 = vld [vmem:[#allocation2 + $0x2dc] ss:$20 sps:$4 sm:$0xff]   ;;  %v3259_v19 = vld [vmem:[#allocation2 + $0x320] ss:$20 sps:$4 sm:$0xff]  }
  0x41   :  { %1398 = vmatprep.subr.bf16.mxu0 %v3181_v23  ;;  %v3280_v16 = vld [vmem:[#allocation2 + $0x2b0] ss:$20 sps:$4 sm:$0xff]   ;;  %v70_v18 = vld [vmem:[%s3890_s0 + $0x18] sm:$0xff]  ;;  %v3267_v21 = vld [vmem:[#allocation2 + $0x34c] ss:$20 sps:$4 sm:$0xff]  }
  0x42   :  { %1520 = vmatpush1.bf16.msra.mxu1 %v3216_v32  ;;  %v3735_v20 = vpack.c.bf16 %v70_v18, %v70_v18  ;;  %v3286_v22 = vld [vmem:[#allocation2 + $0x2d8] ss:$20 sps:$4 sm:$0xff]   ;;  %v3265_v24 = vld [vmem:[#allocation2 + $0x348] ss:$20 sps:$4 sm:$0xff]   ;;  %v3271_v28 = vld [vmem:[#allocation2 + $0x370] ss:$20 sps:$4 sm:$0xff]  }
  0x43   :  { %1521 = vmatprep.subr.bf16.mxu1 %v3220_v33  ;;  %v3294_v23 = vld [vmem:[#allocation2 + $0x304] ss:$20 sps:$4 sm:$0xff]   ;;  %v3273_v25 = vld [vmem:[#allocation2 + $0x374] ss:$20 sps:$4 sm:$0xff]   ;;  %v3279_v29 = vld [vmem:[#allocation2 + $0x39c] ss:$20 sps:$4 sm:$0xff]  }
  0x44   :  { %1399 = vmatpush1.bf16.msra.mxu0 %v3183_v26  ;;  %v3292_v26 = vld [vmem:[#allocation2 + $0x300] ss:$20 sps:$4 sm:$0xff]   ;;  %v3277_v32 = vld [vmem:[#allocation2 + $0x398] ss:$20 sps:$4 sm:$0xff]   ;;  %v3304_v34 = vld [vmem:[#allocation2 + $0x350] ss:$20 sps:$4 sm:$0xff]  }
  0x45   :  { %1400 = vmatprep.subr.bf16.mxu0 %v3187_v27  ;;  %v3300_v27 = vld [vmem:[#allocation2 + $0x32c] ss:$20 sps:$4 sm:$0xff]   ;;  %v3285_v33 = vld [vmem:[#allocation2 + $0x3c4] ss:$20 sps:$4 sm:$0xff]   ;;  %v3351_v18 = vld [vmem:[#allocation2 + $0x57c] ss:$20 sps:$4 sm:$0xff]  }
  0x46   :  { %1522 = vmatpush1.bf16.msra.mxu1 %v3222_v38  ;;  %v3291_v38 = vld [vmem:[#allocation2 + $0x3ec] ss:$20 sps:$4 sm:$0xff]   ;;  %v3319_v61 = vld [vmem:[#allocation2 + $0x4b0] ss:$20 sps:$4 sm:$0xff]  }
  0x47   :  { %1523 = vmatprep.subr.bf16.mxu1 %v3226_v39  ;;  %v3310_v39 = vld [vmem:[#allocation2 + $0x378] ss:$20 sps:$4 sm:$0xff]  }
  0x48   :  { %1401 = vmatpush1.bf16.msra.mxu0 %v3189_v30  ;;  %v3298_v30 = vld [vmem:[#allocation2 + $0x328] ss:$20 sps:$4 sm:$0xff]  }
  0x49   :  { %1402 = vmatprep.subr.bf16.mxu0 %v3193_v31  ;;  %v3306_v31 = vld [vmem:[#allocation2 + $0x354] ss:$20 sps:$4 sm:$0xff]  }
  0x4a   :  { %1524 = vmatpush1.bf16.msra.mxu1 %v3228_v42  ;;  %v3297_v42 = vld [vmem:[#allocation2 + $0x414] ss:$20 sps:$4 sm:$0xff]  }
  0x4b   :  { %1525 = vmatprep.subr.bf16.mxu1 %v3232_v43  ;;  %v3316_v43 = vld [vmem:[#allocation2 + $0x3a0] ss:$20 sps:$4 sm:$0xff]  }
  0x4c   :  { %1403 = vmatpush1.bf16.msra.mxu0 %v3195_v35  ;;  %v3312_v35 = vld [vmem:[#allocation2 + $0x37c] ss:$20 sps:$4 sm:$0xff]  }
  0x4d   :  { %1404 = vmatprep.subr.bf16.mxu0 %v3199_v37  ;;  %v3283_v37 = vld [vmem:[#allocation2 + $0x3c0] ss:$20 sps:$4 sm:$0xff]  }
  0x4e   :  { %1526 = vmatpush1.bf16.msra.mxu1 %v3234_v46  ;;  %v3303_v46 = vld [vmem:[#allocation2 + $0x43c] ss:$20 sps:$4 sm:$0xff]  }
  0x4f   :  { %1527 = vmatprep.subr.bf16.mxu1 %v3238_v47  ;;  %v3322_v47 = vld [vmem:[#allocation2 + $0x3c8] ss:$20 sps:$4 sm:$0xff]  }
  0x50   :  { %1405 = vmatpush1.bf16.msra.mxu0 %v3201_v40  ;;  %v3318_v40 = vld [vmem:[#allocation2 + $0x3a4] ss:$20 sps:$4 sm:$0xff]  }
  0x51   :  { %1406 = vmatprep.subr.bf16.mxu0 %v3205_v41  ;;  %v3289_v41 = vld [vmem:[#allocation2 + $0x3e8] ss:$20 sps:$4 sm:$0xff]  }
  0x52   :  { %1528 = vmatpush1.bf16.msra.mxu1 %v3240_v50  ;;  %v3309_v50 = vld [vmem:[#allocation2 + $0x464] ss:$20 sps:$4 sm:$0xff]  }
  0x53   :  { %1529 = vmatprep.subr.bf16.mxu1 %v3244_v51  ;;  %v3328_v51 = vld [vmem:[#allocation2 + $0x3f0] ss:$20 sps:$4 sm:$0xff]  }
  0x54   :  { %1407 = vmatpush1.bf16.msra.mxu0 %v3207_v44  ;;  %v3324_v44 = vld [vmem:[#allocation2 + $0x3cc] ss:$20 sps:$4 sm:$0xff]  }
  0x55   :  { %1408 = vmatprep.subr.bf16.mxu0 %v3211_v45  ;;  %v3295_v45 = vld [vmem:[#allocation2 + $0x410] ss:$20 sps:$4 sm:$0xff]  }
  0x56   :  { %1530 = vmatpush1.bf16.msra.mxu1 %v3246_v54  ;;  %v3315_v54 = vld [vmem:[#allocation2 + $0x48c] ss:$20 sps:$4 sm:$0xff]  }
  0x57   :  { %1531 = vmatprep.subr.bf16.mxu1 %v3250_v55  ;;  %v3334_v55 = vld [vmem:[#allocation2 + $0x418] ss:$20 sps:$4 sm:$0xff]  }
  0x58   :  { %1409 = vmatpush1.bf16.msra.mxu0 %v3213_v48  ;;  %v3330_v48 = vld [vmem:[#allocation2 + $0x3f4] ss:$20 sps:$4 sm:$0xff]  }
  0x59   :  { %1410 = vmatprep.subr.bf16.mxu0 %v3217_v49  ;;  %v3301_v49 = vld [vmem:[#allocation2 + $0x438] ss:$20 sps:$4 sm:$0xff]  }
  0x5a   :  { %1532 = vmatpush1.bf16.msra.mxu1 %v3252_v59  ;;  %v3340_v59 = vld [vmem:[#allocation2 + $0x440] ss:$20 sps:$4 sm:$0xff]  }
  0x5b   :  { %1533 = vmatprep.subr.bf16.mxu1 %v3256_v60  ;;  %v3348_v60 = vld [vmem:[#allocation2 + $0x46c] ss:$20 sps:$4 sm:$0xff]  }
  0x5c   :  { %1411 = vmatpush1.bf16.msra.mxu0 %v3219_v52  ;;  %v3336_v52 = vld [vmem:[#allocation2 + $0x41c] ss:$20 sps:$4 sm:$0xff]  }
  0x5d   :  { %1412 = vmatprep.subr.bf16.mxu0 %v3223_v53  ;;  %v3307_v53 = vld [vmem:[#allocation2 + $0x460] ss:$20 sps:$4 sm:$0xff]  }
  0x5e   :  { %1534 = vmatpush1.bf16.msra.mxu1 %v3258_v63  ;;  %v3325_v63 = vld [vmem:[#allocation2 + $0x4d8] ss:$20 sps:$4 sm:$0xff]  }
  0x5f   :  { %1535 = vmatprep.subr.bf16.mxu1 %v3262_v1  ;;  %v3346_v1 = vld [vmem:[#allocation2 + $0x468] ss:$20 sps:$4 sm:$0xff]  }
  0x60   :  { %1413 = vmatpush1.bf16.msra.mxu0 %v3225_v56  ;;  %v3342_v56 = vld [vmem:[#allocation2 + $0x444] ss:$20 sps:$4 sm:$0xff]  }
  0x61   :  { %1414 = vmatprep.subr.bf16.mxu0 %v3229_v57  ;;  %v3313_v57 = vld [vmem:[#allocation2 + $0x488] ss:$20 sps:$4 sm:$0xff]  }
  0x62   :  { %1536 = vmatpush1.bf16.msra.mxu1 %v3264_v4  ;;  %v3333_v4 = vld [vmem:[#allocation2 + $0x504] ss:$20 sps:$4 sm:$0xff]  }
  0x63   :  { %1537 = vmatprep.subr.bf16.mxu1 %v3268_v5  ;;  %v3352_v5 = vld [vmem:[#allocation2 + $0x490] ss:$20 sps:$4 sm:$0xff]  }
  0x64   :  { %1415 = vmatpush1.bf16.msra.mxu0 %v3231_v58  ;;  %v3321_v58 = vld [vmem:[#allocation2 + $0x4b4] ss:$20 sps:$4 sm:$0xff]  }
  0x65   :  { %1425 = vmatprep.subr.bf16.mxu0 %v3237_v62  ;;  %v3327_v62 = vld [vmem:[#allocation2 + $0x4dc] ss:$20 sps:$4 sm:$0xff]  }
  0x66   :  { %1538 = vmatpush1.bf16.msra.mxu1 %v3270_v8  ;;  %v3331_v8 = vld [vmem:[#allocation2 + $0x500] ss:$20 sps:$4 sm:$0xff]  }
  0x67   :  { %1417 = vmatmul.mubr.bf16.vlgmr.msra.gmra.mrb[0].mxu0 %v3728_v0  ;;  %1548 = vmatprep.subr.bf16.mxu1 %v3276_v9  ;;  %v3339_v9 = vld [vmem:[#allocation2 + $0x52c] ss:$20 sps:$4 sm:$0xff]  }
  0x68   :  { %1426 = vmatpush1.bf16.msra.mxu0 %v3235_v2  ;;  %1457 = vmatprep.mubr.bf16.mxu0 %v3735_v20  ;;  %v3354_v2 = vld [vmem:[#allocation2 + $0x494] ss:$20 sps:$4 sm:$0xff]  }
  0x69   :  { %1427 = vmatprep.subr.bf16.mxu0 %v3243_v3  ;;  %1540 = vmatmul.mubr.bf16.vlgmr.msra.gmra.mrb[0].mxu1 %v3728_v0  ;;  %v69_v3 = vld [vmem:[%s3890_s0 + $0x10] sm:$0xff] }
  0x6a   :  { %1549 = vmatpush1.bf16.msra.mxu1 %v3274_v12  ;;  %1580 = vmatprep.mubr.bf16.mxu1 %v3735_v20  ;;  %v3337_v12 = vld [vmem:[#allocation2 + $0x528] ss:$20 sps:$4 sm:$0xff]  }
  0x6b   :  { %1550 = vmatprep.subr.bf16.mxu1 %v3282_v13  ;;  %v3631_v13 = vmov 0  }
  0x6c   :  { %1428 = vmatpush1.bf16.msra.mxu0 %v3241_v6  ;;  %v3742_v6 = vpack.c.bf16 %v69_v3, %v69_v3  ;;  %v3446_v3 = vld [vmem:[#allocation4 + $0x30] ss:$8 sps:$4 sm:$0xff]  }
  0x6d   :  { %1429 = vmatprep.subr.bf16.mxu0 %v3249_v7  ;;  %v3360_v7 = vld [vmem:[#allocation2 + $0x4bc] ss:$20 sps:$4 sm:$0xff]  }
  0x6e   :  { %1551 = vmatpush1.bf16.msra.mxu1 %v3280_v16  ;;  %v3399_v16 = vld [vmem:[#allocation2 + $0x3d0] ss:$20 sps:$4 sm:$0xff]  }
  0x6f   :  { %1552 = vmatprep.subr.bf16.mxu1 %v3288_v17  ;;  %v3343_v17 = vld [vmem:[#allocation2 + $0x550] ss:$20 sps:$4 sm:$0xff]  }
  0x70   :  { %1430 = vmatpush1.bf16.msra.mxu0 %v3247_v10  ;;  %v3358_v10 = vld [vmem:[#allocation2 + $0x4b8] ss:$20 sps:$4 sm:$0xff]  }
  0x71   :  { %1431 = vmatprep.subr.bf16.mxu0 %v3255_v11  ;;  %v3366_v11 = vld [vmem:[#allocation2 + $0x4e4] ss:$20 sps:$4 sm:$0xff]  }
  0x72   :  { %1553 = vmatpush1.bf16.msra.mxu1 %v3286_v22  ;;  %v3349_v22 = vld [vmem:[#allocation2 + $0x578] ss:$20 sps:$4 sm:$0xff]  }
  0x73   :  { %1554 = vmatprep.subr.bf16.mxu1 %v3294_v23  ;;  %v3357_v23 = vld [vmem:[#allocation2 + $0x5a4] ss:$20 sps:$4 sm:$0xff]  }
  0x74   :  { %1432 = vmatpush1.bf16.msra.mxu0 %v3253_v14  ;;  %v3345_v14 = vld [vmem:[#allocation2 + $0x554] ss:$20 sps:$4 sm:$0xff]  }
  0x75   :  { %1433 = vmatprep.subr.bf16.mxu0 %v3261_v15  ;;  %v3364_v15 = vld [vmem:[#allocation2 + $0x4e0] ss:$20 sps:$4 sm:$0xff]  }
  0x76   :  { %1555 = vmatpush1.bf16.msra.mxu1 %v3292_v26  ;;  %v3355_v26 = vld [vmem:[#allocation2 + $0x5a0] ss:$20 sps:$4 sm:$0xff]  }
  0x77   :  { %1556 = vmatprep.subr.bf16.mxu1 %v3300_v27  ;;  %v3363_v27 = vld [vmem:[#allocation2 + $0x5cc] ss:$20 sps:$4 sm:$0xff]  }
  0x78   :  { %1434 = vmatpush1.bf16.msra.mxu0 %v3259_v19  ;;  %v3401_v19 = vld [vmem:[#allocation2 + $0x290] ss:$20 sps:$4 sm:$0xff]  }
  0x79   :  { %1435 = vmatprep.subr.bf16.mxu0 %v3267_v21  ;;  %v3403_v21 = vld [vmem:[#allocation2 + $0x3f8] ss:$20 sps:$4 sm:$0xff]  }
  0x7a   :  { %1557 = vmatpush1.bf16.msra.mxu1 %v3298_v30  ;;  %v3361_v30 = vld [vmem:[#allocation2 + $0x5c8] ss:$20 sps:$4 sm:$0xff]  }
  0x7b   :  { %1558 = vmatprep.subr.bf16.mxu1 %v3306_v31  ;;  %v3369_v31 = vld [vmem:[#allocation2 + $0x5f4] ss:$20 sps:$4 sm:$0xff]  }
  0x7c   :  { %1436 = vmatpush1.bf16.msra.mxu0 %v3265_v24  ;;  %v3405_v24 = vld [vmem:[#allocation2 + $0x2b8] ss:$20 sps:$4 sm:$0xff]  }
  0x7d   :  { %1437 = vmatprep.subr.bf16.mxu0 %v3273_v25  ;;  %v3407_v25 = vld [vmem:[#allocation2 + $0x420] ss:$20 sps:$4 sm:$0xff]  }
  0x7e   :  { %1559 = vmatpush1.bf16.msra.mxu1 %v3304_v34  ;;  %v3372_v34 = vld [vmem:[#allocation2 + $0x61c] ss:$20 sps:$4 sm:$0xff]  }
  0x7f   :  { %1560 = vmatprep.subr.bf16.mxu1 %v3312_v35  ;;  %v3417_v35 = vld [vmem:[#allocation2 + $0x330] ss:$20 sps:$4 sm:$0xff]  }
  0x80   :  { %1438 = vmatpush1.bf16.msra.mxu0 %v3271_v28  ;;  %v3409_v28 = vld [vmem:[#allocation2 + $0x2e0] ss:$20 sps:$4 sm:$0xff]  }
  0x81   :  { %1439 = vmatprep.subr.bf16.mxu0 %v3279_v29  ;;  %v3411_v29 = vld [vmem:[#allocation2 + $0x448] ss:$20 sps:$4 sm:$0xff]  }
  0x82   :  { %1561 = vmatpush1.bf16.msra.mxu1 %v3310_v39  ;;  %v71_v39 = vld [vmem:[%s3890_s0 + $0x20] sm:$0xff] }
  0x83   :  { %1562 = vmatprep.subr.bf16.mxu1 %v3318_v40  ;;  %v3375_v40 = vld [vmem:[#allocation2 + $0x50c] ss:$20 sps:$4 sm:$0xff]  }
  0x84   :  { %1440 = vmatpush1.bf16.msra.mxu0 %v3277_v32  ;;  %v3413_v32 = vld [vmem:[#allocation2 + $0x308] ss:$20 sps:$4 sm:$0xff]  }
  0x85   :  { %1441 = vmatprep.subr.bf16.mxu0 %v3285_v33  ;;  %v3415_v33 = vld [vmem:[#allocation2 + $0x470] ss:$20 sps:$4 sm:$0xff]  }
  0x86   :  { %1563 = vmatpush1.bf16.msra.mxu1 %v3316_v43  ;;  %v3423_v43 = vld [vmem:[#allocation2 + $0x4c0] ss:$20 sps:$4 sm:$0xff]  }
  0x87   :  { %1564 = vmatprep.subr.bf16.mxu1 %v3324_v44  ;;  %v3373_v44 = vld [vmem:[#allocation2 + $0x508] ss:$20 sps:$4 sm:$0xff]  }
  0x88   :  { %1442 = vmatpush1.bf16.msra.mxu0 %v3283_v37  ;;  %v3370_v37 = vld [vmem:[#allocation2 + $0x618] ss:$20 sps:$4 sm:$0xff]  }
  0x89   :  { %1443 = vmatprep.subr.bf16.mxu0 %v3291_v38  ;;  %v3419_v38 = vld [vmem:[#allocation2 + $0x498] ss:$20 sps:$4 sm:$0xff]  }
  0x8a   :  { %1565 = vmatpush1.bf16.msra.mxu1 %v3322_v47  ;;  %v3427_v47 = vld [vmem:[#allocation2 + $0x4e8] ss:$20 sps:$4 sm:$0xff]  }
  0x8b   :  { %1566 = vmatprep.subr.bf16.mxu1 %v3330_v48  ;;  %v3376_v48 = vld [vmem:[#allocation2 + $0x530] ss:$20 sps:$4 sm:$0xff]  }
  0x8c   :  { %1444 = vmatpush1.bf16.msra.mxu0 %v3289_v41  ;;  %v3421_v41 = vld [vmem:[#allocation2 + $0x358] ss:$20 sps:$4 sm:$0xff]  }
  0x8d   :  { %1445 = vmatprep.subr.bf16.mxu0 %v3297_v42  ;;  %v3751_v42 = vpack.c.bf16 %v71_v39, %v71_v39  ;;  %v3424_v39 = vld [vmem:[#allocation2 + $0x268] ss:$20 sps:$4 sm:$0xff]  }
  0x8e   :  { %1567 = vmatpush1.bf16.msra.mxu1 %v3328_v51  ;;  %v3428_v51 = vld [vmem:[#allocation2 + $0x3a8] ss:$20 sps:$4 sm:$0xff]  }
  0x8f   :  { %1568 = vmatprep.subr.bf16.mxu1 %v3336_v52  ;;  %v3439_v52 = vld [vmem:[#allocation4 + $0x4] ss:$8 sps:$4 sm:$0xff]  }
  0x90   :  { %1446 = vmatpush1.bf16.msra.mxu0 %v3295_v45  ;;  %v3378_v45 = vld [vmem:[#allocation2 + $0x534] ss:$20 sps:$4 sm:$0xff]  }
  0x91   :  { %1447 = vmatprep.subr.bf16.mxu0 %v3303_v46  ;;  %v3425_v46 = vld [vmem:[#allocation2 + $0x380] ss:$20 sps:$4 sm:$0xff]  }
  0x92   :  { %1569 = vmatpush1.bf16.msra.mxu1 %v3334_v55  ;;  %v3442_v55 = vld [vmem:[#allocation4 + $0x14] ss:$8 sps:$4 sm:$0xff]  }
  0x93   :  { %1570 = vmatprep.subr.bf16.mxu1 %v3342_v56  ;;  %v3382_v56 = vld [vmem:[#allocation2 + $0x580] ss:$20 sps:$4 sm:$0xff]  }
  0x94   :  { %1448 = vmatpush1.bf16.msra.mxu0 %v3301_v49  ;;  %v3381_v49 = vld [vmem:[#allocation2 + $0x55c] ss:$20 sps:$4 sm:$0xff]  }
  0x95   :  { %1449 = vmatprep.subr.bf16.mxu0 %v3309_v50  ;;  %v3379_v50 = vld [vmem:[#allocation2 + $0x558] ss:$20 sps:$4 sm:$0xff]  }
  0x96   :  { %1571 = vmatpush1.bf16.msra.mxu1 %v3340_v59  ;;  %v3445_v59 = vld [vmem:[#allocation4 + $0x24] ss:$8 sps:$4 sm:$0xff]  }
  0x97   :  { %1572 = vmatprep.subr.bf16.mxu1 %v3348_v60  ;;  %v3385_v60 = vld [vmem:[#allocation2 + $0x5a8] ss:$20 sps:$4 sm:$0xff]  }
  0x98   :  { %1450 = vmatpush1.bf16.msra.mxu0 %v3307_v53  ;;  %v3384_v53 = vld [vmem:[#allocation2 + $0x584] ss:$20 sps:$4 sm:$0xff]  }
  0x99   :  { %1451 = vmatprep.subr.bf16.mxu0 %v3315_v54  ;;  %v3437_v54 = vld [vmem:[#allocation4] ss:$8 sps:$4 sm:$0xff]  }
  0x9a   :  { %1573 = vmatpush1.bf16.msra.mxu1 %v3346_v1  ;;  %v3388_v1 = vld [vmem:[#allocation2 + $0x5d0] ss:$20 sps:$4 sm:$0xff]  }
  0x9b   :  { %1574 = vmatprep.subr.bf16.mxu1 %v3354_v2  ;;  %v3393_v2 = vld [vmem:[#allocation2 + $0x5fc] ss:$20 sps:$4 sm:$0xff]  }
  0x9c   :  { %1452 = vmatpush1.bf16.msra.mxu0 %v3313_v57  ;;  %v3387_v57 = vld [vmem:[#allocation2 + $0x5ac] ss:$20 sps:$4 sm:$0xff]  }
  0x9d   :  { %1453 = vmatprep.subr.bf16.mxu0 %v3321_v58  ;;  %v3440_v58 = vld [vmem:[#allocation4 + $0x10] ss:$8 sps:$4 sm:$0xff]  }
  0x9e   :  { %1575 = vmatpush1.bf16.msra.mxu1 %v3352_v5  ;;  %v3391_v5 = vld [vmem:[#allocation2 + $0x5f8] ss:$20 sps:$4 sm:$0xff]  }
  0x9f   :  { %1576 = vmatprep.subr.bf16.mxu1 %v3360_v7  ;;  %v3449_v7 = vld [vmem:[#allocation4 + $0x40] ss:$8 sps:$4 sm:$0xff]  }
  0xa0   :  { %1454 = vmatpush1.bf16.msra.mxu0 %v3319_v61  ;;  %v3390_v61 = vld [vmem:[#allocation2 + $0x5d4] ss:$20 sps:$4 sm:$0xff]  }
  0xa1   :  { %1455 = vmatprep.subr.bf16.mxu0 %v3327_v62  ;;  %v3443_v62 = vld [vmem:[#allocation4 + $0x20] ss:$8 sps:$4 sm:$0xff]  }
  0xa2   :  { %1577 = vmatpush1.bf16.msra.mxu1 %v3358_v10  ;;  %v3397_v10 = vld [vmem:[#allocation2 + $0x150] ss:$20 sps:$4 sm:$0xff]  }
  0xa3   :  { %1578 = vmatprep.subr.bf16.mxu1 %v3366_v11  ;;  %v3452_v11 = vld [vmem:[#allocation4 + $0x50] ss:$8 sps:$4 sm:$0xff]  }
  0xa4   :  { %1456 = vmatpush1.bf16.msra.mxu0 %v3325_v63  ;;  %v3448_v63 = vld [vmem:[#allocation4 + $0x34] ss:$8 sps:$4 sm:$0xff]  }
  0xa5   :  { %1466 = vmatprep.subr.bf16.mxu0 %v3333_v4  ;;  %v3451_v4 = vld [vmem:[#allocation4 + $0x44] ss:$8 sps:$4 sm:$0xff]  }
  0xa6   :  { %1579 = vmatpush1.bf16.msra.mxu1 %v3364_v15  ;;  %v3400_v15 = vld [vmem:[#allocation2 + $0x178] ss:$20 sps:$4 sm:$0xff]  }
  0xa7   :  { %1458 = vmatmul.mubr.bf16.vlgmr.msra.gmra.mrb[0].mxu0 %v3742_v6  ;;  %3025 = vmatprep.subr.bf16.mxu1 %v3399_v16  ;;  %v3455_v16 = vld [vmem:[#allocation4 + $0x60] ss:$8 sps:$4 sm:$0xff]  }
  0xa8   :  { %1467 = vmatpush1.bf16.msra.mxu0 %v3331_v8  ;;  %1498 = vmatprep.mubr.bf16.mxu0 %v3631_v13  ;;  %v3454_v8 = vld [vmem:[#allocation4 + $0x54] ss:$8 sps:$4 sm:$0xff]  }
  0xa9   :  { %1468 = vmatprep.subr.bf16.mxu0 %v3339_v9  ;;  %1581 = vmatmul.mubr.bf16.vlgmr.msra.gmra.mrb[0].mxu1 %v3742_v6  ;;  %v3394_v9 = vld [vmem:[#allocation2 + $0x620] ss:$20 sps:$4 sm:$0xff]  }
  0xaa   :  { %3026 = vmatpush3.bf16.msra.mxu1 %v3401_v19  ;;  %1702 = vmatprep.mubr.bf16.mxu1 %v3735_v20  ;;  %v3367_v20 = vld [vmem:[#allocation2 + $0x5f0] ss:$20 sps:$4 sm:$0xff]   ;;  %v3404_v19 = vld [vmem:[#allocation2 + $0x1a0] ss:$20 sps:$4 sm:$0xff]  }
  0xab   :  { %3027 = vmatprep.subr.bf16.mxu1 %v3403_v21  ;;  %v3458_v21 = vld [vmem:[#allocation4 + $0x70] ss:$8 sps:$4 sm:$0xff]  }
  0xac   :  { %1469 = vmatpush1.bf16.msra.mxu0 %v3337_v12  ;;  %v3457_v12 = vld [vmem:[#allocation4 + $0x64] ss:$8 sps:$4 sm:$0xff]  }
  0xad   :  { %1470 = vmatprep.subr.bf16.mxu0 %v3345_v14  ;;  %v3398_v14 = vld [vmem:[#allocation2 + $0x10] ss:$20 sps:$4 sm:$0xff]  }
  0xae   :  { %3028 = vmatpush3.bf16.msra.mxu1 %v3405_v24  ;;  %v3408_v24 = vld [vmem:[#allocation2 + $0x1c8] ss:$20 sps:$4 sm:$0xff]  }
  0xaf   :  { %3029 = vmatprep.subr.bf16.mxu1 %v3407_v25  ;;  %v3461_v25 = vld [vmem:[#allocation4 + $0x80] ss:$8 sps:$4 sm:$0xff]  }
  0xb0   :  { %1471 = vmatpush1.bf16.msra.mxu0 %v3343_v17  ;;  %v3460_v17 = vld [vmem:[#allocation4 + $0x74] ss:$8 sps:$4 sm:$0xff]  }
  0xb1   :  { %1472 = vmatprep.subr.bf16.mxu0 %v3351_v18  ;;  %v3402_v18 = vld [vmem:[#allocation2 + $0x38] ss:$20 sps:$4 sm:$0xff]  }
  0xb2   :  { %3030 = vmatpush3.bf16.msra.mxu1 %v3409_v28  ;;  %v3412_v28 = vld [vmem:[#allocation2 + $0x1f0] ss:$20 sps:$4 sm:$0xff]  }
  0xb3   :  { %3031 = vmatprep.subr.bf16.mxu1 %v3411_v29  ;;  %v3464_v29 = vld [vmem:[#allocation4 + $0x90] ss:$8 sps:$4 sm:$0xff]  }
  0xb4   :  { %1473 = vmatpush1.bf16.msra.mxu0 %v3349_v22  ;;  %v3463_v22 = vld [vmem:[#allocation4 + $0x84] ss:$8 sps:$4 sm:$0xff]  }
  0xb5   :  { %1474 = vmatprep.subr.bf16.mxu0 %v3357_v23  ;;  %v3406_v23 = vld [vmem:[#allocation2 + $0x60] ss:$20 sps:$4 sm:$0xff]  }
  0xb6   :  { %3032 = vmatpush3.bf16.msra.mxu1 %v3413_v32  ;;  %v3467_v32 = vld [vmem:[#allocation4 + $0xa0] ss:$8 sps:$4 sm:$0xff]  }
  0xb7   :  { %3033 = vmatprep.subr.bf16.mxu1 %v3415_v33  ;;  %v3472_v33 = vld [vmem:[#allocation4 + $0xb4] ss:$8 sps:$4 sm:$0xff]  }
  0xb8   :  { %1475 = vmatpush1.bf16.msra.mxu0 %v3355_v26  ;;  %v3466_v26 = vld [vmem:[#allocation4 + $0x94] ss:$8 sps:$4 sm:$0xff]  }
  0xb9   :  { %1476 = vmatprep.subr.bf16.mxu0 %v3363_v27  ;;  %v3410_v27 = vld [vmem:[#allocation2 + $0x88] ss:$20 sps:$4 sm:$0xff]  }
  0xba   :  { %3034 = vmatpush3.bf16.msra.mxu1 %v3417_v35  ;;  %v3470_v35 = vld [vmem:[#allocation4 + $0xb0] ss:$8 sps:$4 sm:$0xff]  }
  0xbb   :  { %3035 = vmatprep.subr.bf16.mxu1 %v3419_v38  ;;  %v3422_v38 = vld [vmem:[#allocation2 + $0x100] ss:$20 sps:$4 sm:$0xff]  }
  0xbc   :  { %1477 = vmatpush1.bf16.msra.mxu0 %v3361_v30  ;;  %v3414_v30 = vld [vmem:[#allocation2 + $0xb0] ss:$20 sps:$4 sm:$0xff]  }
  0xbd   :  { %1478 = vmatprep.subr.bf16.mxu0 %v3369_v31  ;;  %v3416_v31 = vld [vmem:[#allocation2 + $0x218] ss:$20 sps:$4 sm:$0xff]  }
  0xbe   :  { %3036 = vmatpush3.bf16.msra.mxu1 %v3421_v41  ;;  %v3426_v41 = vld [vmem:[#allocation2 + $0x128] ss:$20 sps:$4 sm:$0xff]  }
  0xbf   :  { %3037 = vmatprep.subr.bf16.mxu1 %v3423_v43  ;;  %v3429_v43 = vld [vmem:[#allocation2 + $0x510] ss:$20 sps:$4 sm:$0xff]  }
  0xc0   :  { %1479 = vmatpush1.bf16.msra.mxu0 %v3367_v20  ;;  %v3418_v20 = vld [vmem:[#allocation2 + $0xd8] ss:$20 sps:$4 sm:$0xff]  }
  0xc1   :  { %1480 = vmatprep.subr.bf16.mxu0 %v3372_v34  ;;  %v3420_v34 = vld [vmem:[#allocation2 + $0x240] ss:$20 sps:$4 sm:$0xff]  }
  0xc2   :  { %3038 = vmatpush3.bf16.msra.mxu1 %v3425_v46  ;;  %v3478_v46 = vld [vmem:[#allocation4 + $0xd4] ss:$8 sps:$4 sm:$0xff]  }
  0xc3   :  { %3039 = vmatprep.subr.bf16.mxu1 %v3427_v47  ;;  %v3430_v47 = vld [vmem:[#allocation2 + $0x538] ss:$20 sps:$4 sm:$0xff]  }
  0xc4   :  { %1481 = vmatpush1.bf16.msra.mxu0 %v3370_v37  ;;  %v3475_v37 = vld [vmem:[#allocation4 + $0xc4] ss:$8 sps:$4 sm:$0xff]  }
  0xc5   :  { %1589 = vmatprep.subr.bf16.mxu0 %v3375_v40  ;;  %v3473_v40 = vld [vmem:[#allocation4 + $0xc0] ss:$8 sps:$4 sm:$0xff]  }
  0xc6   :  { %3040 = vmatpush3.bf16.msra.mxu1 %v3428_v51  ;;  %v3481_v51 = vld [vmem:[#allocation4 + $0xe4] ss:$8 sps:$4 sm:$0xff]  }
  0xc7   :  { %1499 = vmatmul.mubr.bf16.vlgmr.msra.gmra.mrb[0].mxu0 %v3751_v42  ;;  %2252 = vmatprep.subr.bf16.mxu1 %v3439_v52  ;;  %v3479_v52 = vld [vmem:[#allocation4 + $0xe0] ss:$8 sps:$4 sm:$0xff]  }
  0xc8   :  { %1590 = vmatpush1.bf16.msra.mxu0 %v3373_v44  ;;  %1621 = vmatprep.mubr.bf16.mxu0 %v3631_v13  ;;  %v3632_v44 = vmov 0.0  }
  0xc9   :  { %1591 = vmatprep.subr.bf16.mxu0 %v3378_v45  ;;  %1703 = vmatmul.mubr.bf16.vlgmr.msra.gmra.mrb[4].mxu1 %v3742_v6  ;;  %v3396_v6 = vld [vmem:[#allocation2 + $0x624] ss:$20 sps:$4 sm:$0xff]  }
  0xca   :  { %2253 = vmatpush1.bf16.msra.mxu1 %v3437_v54  ;;  %v3476_v45 = vld [vmem:[#allocation4 + $0xd0] ss:$8 sps:$4 sm:$0xff]   ;;  %v3484_v54 = vld [vmem:[#allocation4 + $0xf4] ss:$8 sps:$4 sm:$0xff]  }
  0xcb   :  { %2254 = vmatprep.subr.bf16.mxu1 %v3442_v55  ;;  %v3482_v55 = vld [vmem:[#allocation4 + $0xf0] ss:$8 sps:$4 sm:$0xff]  }
  0xcc   :  { %1592 = vmatpush1.bf16.msra.mxu0 %v3376_v48  ;;  %v3431_v48 = vld [vmem:[#allocation2 + $0x560] ss:$20 sps:$4 sm:$0xff]  }
  0xcd   :  { %1593 = vmatprep.subr.bf16.mxu0 %v3381_v49  ;;  %v3432_v49 = vld [vmem:[#allocation2 + $0x588] ss:$20 sps:$4 sm:$0xff]  }
  0xce   :  { %2255 = vmatpush1.bf16.msra.mxu1 %v3440_v58  ;;  %v3557_v58 = vld [vmem:[%s3895_s5 + $0x40] sm:$0xff]  }
  0xcf   :  { %2256 = vmatprep.subr.bf16.mxu1 %v3445_v59  ;;  %v3558_v59 = vld [vmem:[%s3895_s5] sm:$0xff]  }
  0xd0   :  { %1594 = vmatpush1.bf16.msra.mxu0 %v3379_v50  ;;  %v3434_v50 = vld [vmem:[#allocation2 + $0x5d8] ss:$20 sps:$4 sm:$0xff]  }
  0xd1   :  { %1595 = vmatprep.subr.bf16.mxu0 %v3384_v53  ;;  %v3435_v53 = vld [vmem:[#allocation2 + $0x600] ss:$20 sps:$4 sm:$0xff]  }
  0xd2   :  { %2257 = vmatpush1.bf16.msra.mxu1 %v3443_v62 }
  0xd3   :  { %2258 = vmatprep.subr.bf16.mxu1 %v3448_v63 }
  0xd4   :  { %1596 = vmatpush1.bf16.msra.mxu0 %v3382_v56  ;;  %v3436_v56 = vld [vmem:[#allocation2 + $0x628] ss:$20 sps:$4 sm:$0xff]  }
  0xd5   :  { %1597 = vmatprep.subr.bf16.mxu0 %v3387_v57  ;;  %v3487_v57 = vld [vmem:[#allocation4 + $0x104] ss:$8 sps:$4 sm:$0xff]  }
  0xd6   :  { %2259 = vmatpush1.bf16.msra.mxu1 %v3446_v3  ;;  %v3562_v3 = vld [vmem:[%s3895_s5 + $0x10] sm:$0xff]  }
  0xd7   :  { %2260 = vmatprep.subr.bf16.mxu1 %v3451_v4  ;;  %v3563_v4 = vld [vmem:[%s3895_s5 + $0x58] sm:$0xff]  }
  0xd8   :  { %1598 = vmatpush1.bf16.msra.mxu0 %v3385_v60  ;;  %v3559_v60 = vld [vmem:[%s3895_s5 + $0x48] sm:$0xff]  }
  0xd9   :  { %1599 = vmatprep.subr.bf16.mxu0 %v3390_v61 }
  0xda   :  { %2261 = vmatpush1.bf16.msra.mxu1 %v3449_v7  ;;  %v3565_v7 = vld [vmem:[%s3895_s5 + $0x60] sm:$0xff]  }
  0xdb   :  { %2262 = vmatprep.subr.bf16.mxu1 %v3454_v8 }
  0xdc   :  { %1600 = vmatpush1.bf16.msra.mxu0 %v3388_v1 }
  0xdd   :  { %1601 = vmatprep.subr.bf16.mxu0 %v3393_v2  ;;  %v3561_v2 = vld [vmem:[%s3895_s5 + $0x50] sm:$0xff]  }
  0xde   :  { %2263 = vmatpush1.bf16.msra.mxu1 %v3452_v11  ;;  %v3567_v11 = vld [vmem:[%s3895_s5 + $0x68] sm:$0xff]  }
  0xdf   :  { %2264 = vmatprep.subr.bf16.mxu1 %v3457_v12 }
  0xe0   :  { %1602 = vmatpush1.bf16.msra.mxu0 %v3391_v5  ;;  %v319_v5 = vlaneseq }
  0xe1   :  { %1603 = vmatprep.subr.bf16.mxu0 %v3396_v6  ;;  %v3564_v6 = vld [vmem:[%s3895_s5 + $0x18] sm:$0xff]  }
  0xe2   :  { %2265 = vmatpush1.bf16.msra.mxu1 %v3455_v16  ;;  %v3801_v8 = vshrl.u32 %v319_v5, 7  ;;  %v3520_v5 = vld [vmem:[#allocation4 + $0x1b4] ss:$8 sps:$4 sm:$0xff]  }
  0xe3   :  { %2266 = vmatprep.subr.bf16.mxu1 %v3460_v17 }
  0xe4   :  { %1604 = vmatpush1.bf16.msra.mxu0 %v3394_v9  ;;  %v3566_v9 = vld [vmem:[%s3895_s5 + $0x20] sm:$0xff]   ;;  %v325_v12 = vsub.s32 1, %v3801_v8 }
  0xe5   :  { %3003 = vmatprep.subr.bf16.mxu0 %v3397_v10  ;;  %v321_v10 = vsub.s32 0, %v3801_v8 }
  0xe6   :  { %2267 = vmatpush1.bf16.msra.mxu1 %v3458_v21 }
  0xe7   :  { %1622 = vmatmul.mubr.bf16.vlgmr.msra.gmra.mrb[4].mxu0 %v3751_v42  ;;  %2268 = vmatprep.subr.bf16.mxu1 %v3463_v22 }
  0xe8   :  { %3004 = vmatpush3.bf16.msra.mxu0 %v3398_v14  ;;  %1662 = vmatprep.mubr.bf16.mxu0 %v3721_v36  ;;  %v3469_v36 = vld [vmem:[#allocation4 + $0xa4] ss:$8 sps:$4 sm:$0xff]  }
  0xe9   :  { %3005 = vmatprep.subr.bf16.mxu0 %v3400_v15  ;;  %v3814_v14 = vld [vmem:[%s3892_s2] sm:$0x1f]  ;;  %v3568_v15 = vld [vmem:[%s3895_s5 + $0x28] sm:$0xff]  }
  0xea   :  { %2269 = vmatpush1.bf16.msra.mxu1 %v3461_v25  ;;  %v322_v16 = vrot.slane %v3814_v14, %v321_v10  ;;  %v326_v17 = vrot.slane %v3814_v14, %v325_v12 }
  0xeb   :  { %2270 = vmatprep.subr.bf16.mxu1 %v3466_v26 }
  0xec   :  { %3006 = vmatpush3.bf16.msra.mxu0 %v3402_v18 }
  0xed   :  { %3007 = vmatprep.subr.bf16.mxu0 %v3404_v19 }
  0xee   :  { %2271 = vmatpush1.bf16.msra.mxu1 %v3464_v29 }
  0xef   :  { %2272 = vmatprep.subr.bf16.mxu1 %v3469_v36  ;;  %v3490_v36 = vld [vmem:[#allocation4 + $0x114] ss:$8 sps:$4 sm:$0xff]  }
  0xf0   :  { %3008 = vmatpush3.bf16.msra.mxu0 %v3406_v23 }
  0xf1   :  { %3009 = vmatprep.subr.bf16.mxu0 %v3408_v24 }
  0xf2   :  { %2273 = vmatpush1.bf16.msra.mxu1 %v3467_v32  ;;  %v3493_v32 = vld [vmem:[#allocation4 + $0x124] ss:$8 sps:$4 sm:$0xff]  }
  0xf3   :  { %2274 = vmatprep.subr.bf16.mxu1 %v3472_v33 }
  0xf4   :  { %3010 = vmatpush3.bf16.msra.mxu0 %v3410_v27 }
  0xf5   :  { %3011 = vmatprep.subr.bf16.mxu0 %v3412_v28  ;;  %v3485_v28 = vld [vmem:[#allocation4 + $0x100] ss:$8 sps:$4 sm:$0xff]  }
  0xf6   :  { %2275 = vmatpush1.bf16.msra.mxu1 %v3470_v35 }
  0xf7   :  { %2276 = vmatprep.subr.bf16.mxu1 %v3475_v37  ;;  %v3491_v37 = vld [vmem:[#allocation4 + $0x120] ss:$8 sps:$4 sm:$0xff]  }
  0xf8   :  { %3012 = vmatpush3.bf16.msra.mxu0 %v3414_v30  ;;  %v3488_v30 = vld [vmem:[#allocation4 + $0x110] ss:$8 sps:$4 sm:$0xff]  }
  0xf9   :  { %3013 = vmatprep.subr.bf16.mxu0 %v3416_v31 }
  0xfa   :  { %2277 = vmatpush1.bf16.msra.mxu1 %v3473_v40  ;;  %v3499_v40 = vld [vmem:[#allocation4 + $0x144] ss:$8 sps:$4 sm:$0xff]  }
  0xfb   :  { %2278 = vmatprep.subr.bf16.mxu1 %v3478_v46  ;;  %v333_v46 = vsub.s32 3, %v3801_v8 }
  0xfc   :  { %3014 = vmatpush3.bf16.msra.mxu0 %v3418_v20 }
  0xfd   :  { %3015 = vmatprep.subr.bf16.mxu0 %v3420_v34 }
  0xfe   :  { %2279 = vmatpush1.bf16.msra.mxu1 %v3476_v45  ;;  %v3502_v45 = vld [vmem:[#allocation4 + $0x154] ss:$8 sps:$4 sm:$0xff]  }
  0xff   :  { %2280 = vmatprep.subr.bf16.mxu1 %v3481_v51 }
 0x100   :  { %3016 = vmatpush3.bf16.msra.mxu0 %v3422_v38  ;;  %v3496_v38 = vld [vmem:[#allocation4 + $0x134] ss:$8 sps:$4 sm:$0xff]  }
 0x101   :  { %3017 = vmatprep.subr.bf16.mxu0 %v3424_v39  ;;  %v3494_v39 = vld [vmem:[#allocation4 + $0x130] ss:$8 sps:$4 sm:$0xff]  }
 0x102   :  { %2281 = vmatpush1.bf16.msra.mxu1 %v3479_v52  ;;  %v3508_v52 = vld [vmem:[#allocation4 + $0x174] ss:$8 sps:$4 sm:$0xff]  }
 0x103   :  { %2282 = vmatprep.subr.bf16.mxu1 %v3484_v54 }
 0x104   :  { %3018 = vmatpush3.bf16.msra.mxu0 %v3426_v41  ;;  %v3497_v41 = vld [vmem:[#allocation4 + $0x140] ss:$8 sps:$4 sm:$0xff]  }
 0x105   :  { %3084 = vmatprep.subr.bf16.mxu0 %v3632_v44 }
 0x106   :  { %2283 = vmatpush1.bf16.msra.mxu1 %v3482_v55 }
 0x107   :  { %1663 = vmatmul.mubr.bf16.vlgmr.msra.gmra.mrb[8].mxu0 %v3728_v0  ;;  %v3433_v0 = vld [vmem:[#allocation2 + $0x5b0] ss:$20 sps:$4 sm:$0xff]   ;;  %2293 = vmatprep.subr.bf16.mxu1 %v3487_v57 }
 0x108   :  { %3085 = vmatpush3.bf16.msra.mxu0 %v3429_v43  ;;  %3100 = vmatprep.mubr.msk.bf16.mxu0 %vm3633_vm0, %v3632_v44  ;;  %v329_v43 = vsub.s32 2, %v3801_v8 }
 0x109   :  { %3086 = vmatprep.subr.bf16.mxu0 %v3632_v44 }
 0x10c   :  { %3087 = vmatpush3.bf16.msra.mxu0 %v3430_v47  ;;  %v3500_v47 = vld [vmem:[#allocation4 + $0x150] ss:$8 sps:$4 sm:$0xff]  }
 0x10d   :  { %3088 = vmatprep.subr.bf16.mxu0 %v3632_v44 }
 0x110   :  { %3089 = vmatpush3.bf16.msra.mxu0 %v3431_v48  ;;  %v330_v48 = vrot.slane %v3814_v14, %v329_v43  ;;  %v3553_v43 = vld [vmem:[#allocation4 + $0x264] ss:$8 sps:$4 sm:$0xff]  }
 0x111   :  { %3090 = vmatprep.subr.bf16.mxu0 %v3632_v44 }
 0x114   :  { %3091 = vmatpush3.bf16.msra.mxu0 %v3432_v49  ;;  %v3505_v49 = vld [vmem:[#allocation4 + $0x164] ss:$8 sps:$4 sm:$0xff]  }
 0x115   :  { %3092 = vmatprep.subr.bf16.mxu0 %v3632_v44 }
 0x118   :  { %3093 = vmatpush3.bf16.msra.mxu0 %v3433_v0  ;;  %v334_v0 = vrot.slane %v3814_v14, %v333_v46 }
 0x119   :  { %3094 = vmatprep.subr.bf16.mxu0 %v3632_v44 }
 0x11c   :  { %3095 = vmatpush3.bf16.msra.mxu0 %v3434_v50  ;;  %v3503_v50 = vld [vmem:[#allocation4 + $0x160] ss:$8 sps:$4 sm:$0xff]  }
 0x11d   :  { %3096 = vmatprep.subr.bf16.mxu0 %v3632_v44 }
 0x120   :  { %3097 = vmatpush3.bf16.msra.mxu0 %v3435_v53 }
 0x121   :  { %3098 = vmatprep.subr.bf16.mxu0 %v3632_v44 }
 0x124   :  { %3099 = vmatpush3.bf16.msra.mxu0 %v3436_v56 }
 0x125   :  { %3056 = vmatprep.subr.bf16.mxu0 %v3557_v58 }
 0x127   :  { %3101 = vmatmul.mubr.bf16.vlgmr.msra.gmra.mrb[12].mxu0 %v3751_v42  ;;  %v3560_v42 = vld [vmem:[%s3895_s5 + $0x8] sm:$0xff]  }
 0x128   :  { %3057 = vmatpush3.bf16.msra.mxu0 %v3558_v59  ;;  %v3506_v59 = vld [vmem:[#allocation4 + $0x170] ss:$8 sps:$4 sm:$0xff]  }
 0x129   :  { %3058 = vmatprep.subr.bf16.mxu0 %v3559_v60 }
 0x12c   :  { %3059 = vmatpush3.bf16.msra.mxu0 %v3560_v42 }
 0x12d   :  { %3060 = vmatprep.subr.bf16.mxu0 %v3561_v2  ;;  %v3509_v2 = vld [vmem:[#allocation4 + $0x180] ss:$8 sps:$4 sm:$0xff]  }
 0x130   :  { %3061 = vmatpush3.bf16.msra.mxu0 %v3562_v3  ;;  %v3512_v3 = vld [vmem:[#allocation4 + $0x190] ss:$8 sps:$4 sm:$0xff]  }
 0x131   :  { %3062 = vmatprep.subr.bf16.mxu0 %v3563_v4  ;;  %v3515_v4 = vld [vmem:[#allocation4 + $0x1a0] ss:$8 sps:$4 sm:$0xff]  }
 0x134   :  { %3063 = vmatpush3.bf16.msra.mxu0 %v3564_v6  ;;  %v3518_v6 = vld [vmem:[#allocation4 + $0x1b0] ss:$8 sps:$4 sm:$0xff]  }
 0x135   :  { %3064 = vmatprep.subr.bf16.mxu0 %v3565_v7  ;;  %v3523_v7 = vld [vmem:[#allocation4 + $0x1c4] ss:$8 sps:$4 sm:$0xff]  }
 0x138   :  { %3065 = vmatpush3.bf16.msra.mxu0 %v3566_v9  ;;  %v3521_v9 = vld [vmem:[#allocation4 + $0x1c0] ss:$8 sps:$4 sm:$0xff]  }
 0x139   :  { %3066 = vmatprep.subr.bf16.mxu0 %v3567_v11  ;;  %v3526_v11 = vld [vmem:[#allocation4 + $0x1d4] ss:$8 sps:$4 sm:$0xff]  }
 0x13c   :  { %3067 = vmatpush3.bf16.msra.mxu0 %v3568_v15  ;;  %v3524_v15 = vld [vmem:[#allocation4 + $0x1d0] ss:$8 sps:$4 sm:$0xff]  }
 0x17c   :  { %v3779_v61 = vpop.f32.mrb[0].mxu1 }
 0x17d   :  { %v3781_v62 = vpop.f32.mrb[1].mxu1  ;;  %v3122_v51 = vadd.f32 %v3779_v61, %v330_v48  ;;  %v3514_v61 = vld [vmem:[#allocation4 + $0x194] ss:$8 sps:$4 sm:$0xff]  }
 0x17e   :  { %v1586_v63 = vpop.f32.mrb[2].mxu1  ;;  %v3124_v53 = vadd.f32 %v3781_v62, %v334_v0  ;;  %v3517_v62 = vld [vmem:[#allocation4 + $0x1a4] ss:$8 sps:$4 sm:$0xff]   ;;  %v3554_v0 = vld [vmem:[#allocation4 + $0x270] ss:$8 sps:$4 sm:$0xff]  }
 0x17f   :  { %v1587_v1 = vpop.f32.mrb[3].mxu1  ;;  %v3511_v63 = vld [vmem:[#allocation4 + $0x184] ss:$8 sps:$4 sm:$0xff]  }
 0x19a   :  { %v1500_v18 = vpop.f32.mrb[0].mxu0 }
 0x19b   :  { %v3120_v19 = vadd.f32 %v1500_v18, %v322_v16  ;;  %v1502_v21 = vpop.f32.mrb[1].mxu0  ;;  %v3529_v16 = vld [vmem:[#allocation4 + $0x1e4] ss:$8 sps:$4 sm:$0xff]   ;;  %v3527_v18 = vld [vmem:[#allocation4 + $0x1e0] ss:$8 sps:$4 sm:$0xff]  }
 0x19c   :  { %v3121_v22 = vadd.f32 %v1502_v21, %v326_v17  ;;  %v1504_v23 = vpop.f32.mrb[2].mxu0  ;;  %v3041_v31 = vpop.f32.mrb[4].mxu1  ;;  %v337_v17 = vsub.s32 4, %v3801_v8  ;;  %v3573_v8 = vld [vmem:[%s3897_s7] sm:$0xff]  }
 0x19d   :  { %v1750_v24 = vmax.f32 %v3120_v19, 0.0  ;;  %v1505_v25 = vpop.f32.mrb[3].mxu0  ;;  %v3042_v33 = vpop.f32.mrb[5].mxu1  ;;  %v3532_v19 = vld [vmem:[#allocation4 + $0x1f4] ss:$8 sps:$4 sm:$0xff]  }
 0x19e   :  { %v1751_v26 = vmax.f32 %v3121_v22, 0.0  ;;  %v3825_v20 = vadd.f32 %v3042_v33, %v3041_v31  ;;  %v3044_v34 = vpop.f32.mrb[6].mxu1  ;;  %v338_v22 = vrot.slane %v3814_v14, %v337_v17  ;;  %v3538_v33 = vld [vmem:[#allocation4 + $0x214] ss:$8 sps:$4 sm:$0xff]   ;;  %v3536_v14 = vld [vmem:[#allocation4 + $0x210] ss:$8 sps:$4 sm:$0xff]  }
 0x19f   :  { %v1755_v29 = vpack.c.bf16 %v1750_v24, %v1750_v24  ;;  %v3045_v35 = vpop.f32.mrb[7].mxu1  ;;  %v3541_v34 = vld [vmem:[#allocation4 + $0x224] ss:$8 sps:$4 sm:$0xff]  }
 0x1a0   :  { %v1756_v27 = vpack.c.bf16 %v1751_v26, %v1751_v26  ;;  %v3530_v26 = vld [vmem:[#allocation4 + $0x1f0] ss:$8 sps:$4 sm:$0xff]   ;;  %v3539_v35 = vld [vmem:[#allocation4 + $0x220] ss:$8 sps:$4 sm:$0xff]  }
 0x1a2   :  { %2284 = vmatprep.mubr.bf16.mxu1 %v1756_v27 }
 0x1a3   :  { %2285 = vmatmul.mubr.bf16.vlgmr.msra.gmra.mrb[8].mxu1 %v1755_v29  ;;  %v3535_v29 = vld [vmem:[#allocation4 + $0x204] ss:$8 sps:$4 sm:$0xff]  }
 0x1a4   :  { %2294 = vmatpush1.bf16.msra.mxu1 %v3485_v28 }
 0x1a5   :  { %2295 = vmatprep.subr.bf16.mxu1 %v3490_v36 }
 0x1a8   :  { %2296 = vmatpush1.bf16.msra.mxu1 %v3488_v30  ;;  %v3533_v30 = vld [vmem:[#allocation4 + $0x200] ss:$8 sps:$4 sm:$0xff]  }
 0x1a9   :  { %2297 = vmatprep.subr.bf16.mxu1 %v3493_v32 }
 0x1ac   :  { %2298 = vmatpush1.bf16.msra.mxu1 %v3491_v37  ;;  %v3544_v37 = vld [vmem:[#allocation4 + $0x234] ss:$8 sps:$4 sm:$0xff]  }
 0x1ad   :  { %2299 = vmatprep.subr.bf16.mxu1 %v3496_v38  ;;  %v3542_v38 = vld [vmem:[#allocation4 + $0x230] ss:$8 sps:$4 sm:$0xff]  }
 0x1b0   :  { %2300 = vmatpush1.bf16.msra.mxu1 %v3494_v39  ;;  %v3547_v39 = vld [vmem:[#allocation4 + $0x244] ss:$8 sps:$4 sm:$0xff]  }
 0x1b1   :  { %2301 = vmatprep.subr.bf16.mxu1 %v3499_v40  ;;  %v3550_v40 = vld [vmem:[#allocation4 + $0x254] ss:$8 sps:$4 sm:$0xff]  }
 0x1b4   :  { %2302 = vmatpush1.bf16.msra.mxu1 %v3497_v41  ;;  %v3548_v41 = vld [vmem:[#allocation4 + $0x250] ss:$8 sps:$4 sm:$0xff]  }
 0x1b5   :  { %2303 = vmatprep.subr.bf16.mxu1 %v3502_v45  ;;  %v3556_v45 = vld [vmem:[#allocation4 + $0x274] ss:$8 sps:$4 sm:$0xff]  }
 0x1b8   :  { %2304 = vmatpush1.bf16.msra.mxu1 %v3500_v47 }
 0x1b9   :  { %2305 = vmatprep.subr.bf16.mxu1 %v3505_v49 }
 0x1ba   :  { %v1623_v54 = vpop.f32.mrb[4].mxu0 }
 0x1bb   :  { %v3123_v55 = vadd.f32 %v3122_v51, %v1623_v54  ;;  %v1625_v56 = vpop.f32.mrb[5].mxu0  ;;  %v3570_v54 = vld [vmem:[%s3895_s5 + $0x30] sm:$0xff]  }
 0x1bc   :  { %v3125_v57 = vadd.f32 %v3124_v53, %v1625_v56  ;;  %2306 = vmatpush1.bf16.msra.mxu1 %v3503_v50  ;;  %v1627_v58 = vpop.f32.mrb[6].mxu0  ;;  %v3569_v53 = vld [vmem:[%s3895_s5 + $0x70] sm:$0xff]   ;;  %v3572_v56 = vld [vmem:[%s3895_s5 + $0x38] sm:$0xff]  }
 0x1bd   :  { %v1628_v60 = vpop.f32.mrb[7].mxu0  ;;  %2307 = vmatprep.subr.bf16.mxu1 %v3508_v52  ;;  %v1752_v27 = vmax.f32 %v3123_v55, 0.0  ;;  %3068 = vmatprep.subr.bf16.mxu0 %v3569_v53  ;;  %v3571_v55 = vld [vmem:[%s3895_s5 + $0x78] sm:$0xff]  }
 0x1be   :  { %v1753_v42 = vmax.f32 %v3125_v57, 0.0  ;;  %3069 = vmatpush3.bf16.msra.mxu0 %v3570_v54  ;;  %v1840_v57 = vld [vmem:[%s3894_s4] sm:$0x3] }
 0x1bf   :  { %v1757_v32 = vpack.c.bf16 %v1752_v27, %v1752_v27  ;;  %3070 = vmatprep.subr.bf16.mxu0 %v3571_v55  ;;  %v1845_v58 = vrot.slane %v1840_v57, %v321_v10  ;;  %v3574_v10 = vld [vmem:[%s3897_s7 + $0x8] sm:$0xff]  }
 0x1c0   :  { %v1758_v1 = vpack.c.bf16 %v1753_v42, %v1753_v42  ;;  %2308 = vmatpush1.bf16.msra.mxu1 %v3506_v59  ;;  %v1849_v59 = vrot.slane %v1840_v57, %v325_v12 }
 0x1c1   :  { %2309 = vmatprep.subr.bf16.mxu1 %v3511_v63 }
 0x1c2   :  { %2325 = vmatprep.mubr.bf16.mxu1 %v1758_v1  ;;  %3071 = vmatpush3.bf16.msra.mxu0 %v3572_v56 }
 0x1c3   :  { %3104 = vmatprep.subr.bf16.mxu0 %v3632_v44 }
 0x1c4   :  { %2310 = vmatpush1.bf16.msra.mxu1 %v3509_v2 }
 0x1c5   :  { %2311 = vmatprep.subr.bf16.mxu1 %v3514_v61 }
 0x1c8   :  { %2312 = vmatpush1.bf16.msra.mxu1 %v3512_v3 }
 0x1c9   :  { %2313 = vmatprep.subr.bf16.mxu1 %v3517_v62 }
 0x1cc   :  { %2314 = vmatpush1.bf16.msra.mxu1 %v3515_v4 }
 0x1cd   :  { %2315 = vmatprep.subr.bf16.mxu1 %v3520_v5 }
 0x1d0   :  { %2316 = vmatpush1.bf16.msra.mxu1 %v3518_v6  ;;  %v2978_v6 = vld [vmem:[%s3896_s6] ss:$0 sm:$0xff] }
 0x1d1   :  { %2317 = vmatprep.subr.bf16.mxu1 %v3523_v7 }
 0x1d4   :  { %2318 = vmatpush1.bf16.msra.mxu1 %v3521_v9 }
 0x1d5   :  { %2319 = vmatprep.subr.bf16.mxu1 %v3526_v11 }
 0x1d8   :  { %2320 = vmatpush1.bf16.msra.mxu1 %v3524_v15 }
 0x1d9   :  { %2321 = vmatprep.subr.bf16.mxu1 %v3529_v16 }
 0x1da   :  { %v3019_v21 = vpop.f32.mrb[8].mxu0 }
 0x1db   :  { %v3020_v23 = vpop.f32.mrb[9].mxu0 }
 0x1dc   :  { %v3021_v24 = vadd.f32 %v3020_v23, %v3019_v21  ;;  %2322 = vmatpush1.bf16.msra.mxu1 %v3527_v18  ;;  %v3022_v25 = vpop.f32.mrb[10].mxu0  ;;  %v3575_v18 = vld [vmem:[%s3899_s9] sm:$0xff]   ;;  %v3576_v21 = vld [vmem:[%s3899_s9 + $0x8] sm:$0xff]  }
 0x1dd   :  { %v3023_v28 = vpop.f32.mrb[11].mxu0  ;;  %2323 = vmatprep.subr.bf16.mxu1 %v3532_v19 }
 0x1de   :  { %v1665_v36 = vadd.f32 %v3021_v24, %v338_v22  ;;  %v2995_v22 = vld [vmem:[%s3898_s8] ss:$0 sm:$0xff] }
 0x1e0   :  { %2324 = vmatpush1.bf16.msra.mxu1 %v3530_v26  ;;  %v1705_v31 = vadd.f32 %v3825_v20, %v1665_v36  ;;  %v3545_v20 = vld [vmem:[#allocation4 + $0x240] ss:$8 sps:$4 sm:$0xff]  }
 0x1e1   :  { %2334 = vmatprep.subr.bf16.mxu1 %v3535_v29 }
 0x1e3   :  { %2326 = vmatmul.mubr.bf16.vlgmr.msra.gmra.mrb[8].mxu1 %v1757_v32 }
 0x1e4   :  { %2335 = vmatpush1.bf16.msra.mxu1 %v3533_v30  ;;  %2366 = vmatprep.mubr.bf16.mxu1 %v3631_v13  ;;  %v3551_v13 = vld [vmem:[#allocation4 + $0x260] ss:$8 sps:$4 sm:$0xff]  }
 0x1e5   :  { %2336 = vmatprep.subr.bf16.mxu1 %v3538_v33 }
 0x1e8   :  { %2337 = vmatpush1.bf16.msra.mxu1 %v3536_v14 }
 0x1e9   :  { %2338 = vmatprep.subr.bf16.mxu1 %v3541_v34 }
 0x1ec   :  { %2339 = vmatpush1.bf16.msra.mxu1 %v3539_v35 }
 0x1ed   :  { %2340 = vmatprep.subr.bf16.mxu1 %v3544_v37 }
 0x1f0   :  { %2341 = vmatpush1.bf16.msra.mxu1 %v3542_v38 }
 0x1f1   :  { %2342 = vmatprep.subr.bf16.mxu1 %v3547_v39 }
 0x1f4   :  { %2343 = vmatpush1.bf16.msra.mxu1 %v3545_v20 }
 0x1f5   :  { %2344 = vmatprep.subr.bf16.mxu1 %v3550_v40 }
 0x1f8   :  { %2345 = vmatpush1.bf16.msra.mxu1 %v3548_v41 }
 0x1f9   :  { %2346 = vmatprep.subr.bf16.mxu1 %v3553_v43 }
 0x1fa   :  { %v1744_v46 = vpop.f32.mrb[12].mxu0 }
 0x1fb   :  { %v1745_v47 = vadd.f32 %v1744_v46, %v1705_v31  ;;  %v3102_v48 = vpop.f32.mrb[13].mxu0 }
 0x1fc   :  { %2347 = vmatpush1.bf16.msra.mxu1 %v3551_v13  ;;  %v1747_v49 = vpop.f32.mrb[14].mxu0 }
 0x1fd   :  { %v1754_v50 = vmax.f32 %v1745_v47, 0.0  ;;  %v3103_v51 = vpop.f32.mrb[15].mxu0  ;;  %2348 = vmatprep.subr.bf16.mxu1 %v3556_v45 }
 0x1ff   :  { %v1759_v52 = vpack.c.bf16 %v1754_v50, %v1754_v50 }
 0x200   :  { %2349 = vmatpush1.bf16.msra.mxu1 %v3554_v0 }
 0x203   :  { %2367 = vmatmul.mubr.bf16.vlgmr.msra.gmra.mrb[8].mxu1 %v1759_v52 }
 0x2d6   :  { %v2368_v60 = vpop.f32.mrb[8].mxu1 }
 0x2d7   :  { %v3126_v63 = vadd.f32 %v2368_v60, %v1845_v58  ;;  %v2370_v42 = vpop.f32.mrb[9].mxu1 }
 0x2d8   :  { %v3127_v1 = vadd.f32 %v2370_v42, %v1849_v59  ;;  %v2372_v2 = vpop.f32.mrb[10].mxu1 }
 0x2d9   :  { %v2375_v61 = vmax.f32 %v3126_v63, 0.0  ;;  %v2373_v3 = vpop.f32.mrb[11].mxu1 }
 0x2da   :  { %v2376_v62 = vmax.f32 %v3127_v1, 0.0 }
 0x2db   :  { %v2377_v5 = vpack.c.bf16 %v2375_v61, %v2375_v61 }
 0x2dc   :  { %v2378_v4 = vpack.c.bf16 %v2376_v62, %v2376_v62 }
 0x2de   :  { %2546 = vmatprep.mubr.bf16.mxu0 %v2378_v4 }
 0x2df   :  { %2547 = vmatmul.mubr.bf16.vlgmr.msra.gmra.mrb[16].mxu0 %v2377_v5 }
 0x2e0   :  { %3108 = vmatprep.mubr.msk.bf16.mxu0 %vm3633_vm0, %v3632_v44  ;;  %3105 = vmatpush3.bf16.msra.mxu0 %v3573_v8 }
 0x2e1   :  { %3106 = vmatprep.subr.bf16.mxu0 %v3632_v44 }
 0x2e4   :  { %3107 = vmatpush3.bf16.msra.mxu0 %v3574_v10 }
 0x2e5   :  { %3112 = vmatprep.subr.bf16.mxu0 %v3632_v44 }
 0x3b2   :  { %v3072_v12 = vpop.f32.mrb[16].mxu0 }
 0x3b3   :  { %v3073_v7 = vpop.f32.mrb[17].mxu0 }
 0x3b4   :  { %v3074_v9 = vadd.f32 %v3073_v7, %v3072_v12  ;;  %v3075_v11 = vpop.f32.mrb[18].mxu0 }
 0x3b5   :  { %v3076_v15 = vpop.f32.mrb[19].mxu0 }
 0x3b6   :  { %v2549_v16 = vadd.f32 %v3074_v9, %v2978_v6 }
 0x3b8   :  { %v2554_v17 = vmax.f32 %v2549_v16, 0.0 }
 0x3ba   :  { %v2555_v19 = vpack.c.bf16 %v2554_v17, %v2554_v17 }
 0x3bc   :  { %3109 = vmatmul.mubr.msk.bf16.vlgmr.msra.gmra.mrb[20].mxu0 %vm2579_vm1, %v2555_v19 }
 0x3bd   :  { %3113 = vmatpush3.bf16.msra.mxu0 %v3575_v18  ;;  %3116 = vmatprep.mubr.msk.bf16.mxu0 %vm3633_vm0, %v3632_v44 }
 0x3be   :  { %3114 = vmatprep.subr.bf16.mxu0 %v3632_v44  ;;  %v2999_v44 = vld [vmem:[%s3900_s10] ss:$0 sm:$0xff] }
 0x3c1   :  { %3115 = vmatpush3.bf16.msra.mxu0 %v3576_v21 }
 0x48f   :  { %v2617_v23 = vpop.f32.mrb[20].mxu0 }
 0x490   :  { %v2618_v24 = vadd.f32 %v2995_v22, %v2617_v23  ;;  %v3110_v25 = vpop.f32.mrb[21].mxu0 }
 0x491   :  { %v2620_v26 = vpop.f32.mrb[22].mxu0 }
 0x492   :  { %v2623_v27 = vmax.f32 %v2618_v24, 0.0  ;;  %v3111_v28 = vpop.f32.mrb[23].mxu0 }
 0x494   :  { %v2624_v29 = vpack.c.bf16 %v2623_v27, %v2623_v27 }
 0x496   :  { %3117 = vmatmul.mubr.msk.bf16.vlgmr.msra.gmra.mrb[24].mxu0 %vm2579_vm1, %v2624_v29 }
 0x569   :  { %v2685_v36 = vpop.f32.mrb[24].mxu0 }
 0x56a   :  { %v2686_v30 = vadd.f32 %v2999_v44, %v2685_v36  ;;  %v3118_v31 = vpop.f32.mrb[25].mxu0 }
 0x56b   :  { %v2688_v32 = vpop.f32.mrb[26].mxu0 }
 0x56c   :  { %2691 = vst [vmem:[%s3901_s11] sm:$0xff] %v2686_v30  ;;  %v3119_v33 = vpop.f32.mrb[27].mxu0 }
 0x56d   :  { %2696 = vsyncpa [#allocation3], 1 }
 0x56e   :  { %2697 = vsyncpa [#allocation5], 1 }

</bundles_post_ra>
